<compile_context>
chip_gen: v5e
topology: v5e:2x2
jax: 0.10.0
libtpu: 0.0.40
codegen_flags: <defaults>
</compile_context>

<pallas_src>
import jax
import jax.numpy as jnp
from jax.experimental import pallas as pl
from jax.experimental.pallas import tpu as pltpu


def _round_up(x, m):
    return ((x + m - 1) // m) * m


def _ceil_div(a, b):
    return (a + b - 1) // b


def _mlp_fused_kernel(x_ref, w1_ref, b1_ref, w2_ref, b2_ref, o_ref, acc1_ref):
    """out = relu(relu(x @ W1t + b1) @ W2t + b2) for one batch block.

    Grid = (B/tb, K1/tk1).  Axis 0 (batch) is "parallel"; axis 1 (input
    features) is the reduction for layer 1 and is marked "arbitrary".
      acc1: (tb, N1p) f32 -- layer-1 partial sums, resident across the k axis.
    Layer 2 runs once per batch block on the last k step (W2 fully resident).
    """
    k = pl.program_id(1)
    nk = pl.num_programs(1)

    @pl.when(k == 0)
    def _():
        acc1_ref[...] = jnp.zeros_like(acc1_ref)

    # Layer-1 partial: (tb, tk1) bf16 @ (tk1, N1p) bf16 -> f32 accumulate.
    acc1_ref[...] += jnp.dot(x_ref[...], w1_ref[...],
                             preferred_element_type=jnp.float32)

    @pl.when(k == nk - 1)
    def _():
        # Finish layer 1 for this batch block: bias + ReLU (Dropout p=0 = id).
        h = jnp.maximum(acc1_ref[...] + b1_ref[...], 0.0)
        # Layer 2 in one shot over the fully-resident hidden dimension.
        out = jnp.dot(h.astype(jnp.bfloat16), w2_ref[...],
                      preferred_element_type=jnp.float32)
        out = out + b2_ref[...]
        o_ref[...] = jnp.maximum(out, 0.0).astype(o_ref.dtype)


def _vmem_limit_bytes():
    """Generation-aware VMEM limit: 3/4 of physical, capped at 100 MiB.

    v7x (64 MiB physical) -> 48 MiB; v5e/v6e (128 MiB) -> 96 MiB.  Never
    request the full physical VMEM (compiler-internal scratch needs room).
    """
    cap = 64 * 1024 * 1024
    try:
        cap = int(pltpu.get_tpu_info().vmem_capacity_bytes)
    except Exception:  # pragma: no cover - conservative fallback
        pass
    return max(32 * 1024 * 1024, min(100 * 1024 * 1024, (cap * 3) // 4))


def mlp_encoder_fused(x_pad, w1_pad, b1_pad, w2_pad, b2_pad, *, tb, tk1):
    """x_pad:(Bp,K1p) bf16, w1_pad:(K1p,N1p) bf16, b1_pad:(1,N1p) f32,
    w2_pad:(N1p,N2p) bf16, b2_pad:(1,N2p) f32  ->  (Bp,N2p) f32."""
    Bp, K1p = x_pad.shape
    _, N1p = w1_pad.shape
    _, N2p = w2_pad.shape
    assert Bp % tb == 0 and K1p % tk1 == 0  # guaranteed by the wrapper padding

    nb = Bp // tb
    nk = K1p // tk1

    flops = 2 * Bp * K1p * N1p + 2 * Bp * N1p * N2p
    bytes_accessed = (x_pad.size * 2 + w1_pad.size * 2 + w2_pad.size * 2
                      + b1_pad.size * 4 + b2_pad.size * 4 + Bp * N2p * 4)

    return pl.pallas_call(
        _mlp_fused_kernel,
        out_shape=jax.ShapeDtypeStruct((Bp, N2p), jnp.float32),
        grid_spec=pltpu.PrefetchScalarGridSpec(
            num_scalar_prefetch=0,
            grid=(nb, nk),
            in_specs=[
                pl.BlockSpec((tb, tk1), lambda b, k: (b, k)),    # x (bf16)
                pl.BlockSpec((tk1, N1p), lambda b, k: (k, 0)),   # W1^T tile
                pl.BlockSpec((1, N1p), lambda b, k: (0, 0)),     # b1 (resident)
                pl.BlockSpec((N1p, N2p), lambda b, k: (0, 0)),   # W2^T (resident)
                pl.BlockSpec((1, N2p), lambda b, k: (0, 0)),     # b2 (resident)
            ],
            out_specs=pl.BlockSpec((tb, N2p), lambda b, k: (b, 0)),
            scratch_shapes=[
                pltpu.VMEM((tb, N1p), jnp.float32),   # layer-1 accumulator
            ],
        ),
        compiler_params=pltpu.CompilerParams(
            # Batch axis is independent (megacore-shardable on v7x); the
            # input-feature axis is the layer-1 reduction.
            dimension_semantics=("parallel", "arbitrary"),
            vmem_limit_bytes=_vmem_limit_bytes(),
        ),
        cost_estimate=pl.CostEstimate(
            flops=flops, transcendentals=0, bytes_accessed=bytes_accessed),
    )(x_pad, w1_pad, b1_pad, w2_pad, b2_pad)


_HIDDEN1 = 1024  # fixed by the PyTorch module definition


class MLPEncoderPallas:
    """JAX/Pallas port of MLPEncoder(num_genes, num_hiddens, p_drop=0.0)."""

    def __init__(self, num_genes, num_hiddens, key, hidden1=_HIDDEN1,
                 dtype=jnp.float32, tk1_max=4096, tb_max=256):
        self.num_genes = num_genes
        self.hidden1 = hidden1
        self.num_hiddens = num_hiddens
        self._tb_max = tb_max

        k1, k2, k3, k4 = jax.random.split(key, 4)

        # PyTorch nn.Linear default init: U(-1/sqrt(fan_in), 1/sqrt(fan_in)).
        def init_linear(kw, kb, fan_in, fan_out):
            bound = 1.0 / (fan_in ** 0.5)
            w = jax.random.uniform(kw, (fan_out, fan_in), dtype, -bound, bound)
            b = jax.random.uniform(kb, (fan_out,), dtype, -bound, bound)
            return w, b

        w1, b1 = init_linear(k1, k2, num_genes, hidden1)
        w2, b2 = init_linear(k3, k4, hidden1, num_hiddens)

        # Pre-transpose to (in, out) and store weights in bf16 (halves HBM
        # bytes; the kernel accumulates in f32).  Biases stay f32.
        self.w1_t = w1.T.astype(jnp.bfloat16)
        self.b1 = b1.astype(jnp.float32)
        self.w2_t = w2.T.astype(jnp.bfloat16)
        self.b2 = b2.astype(jnp.float32)

        # Input-feature tiling: a handful of large, 128-aligned tiles sized to
        # minimise zero padding (each <= tk1_max).  Hidden1 stays fully
        # resident, so x is streamed exactly once.
        k1_128 = _round_up(num_genes, 128)
        nk = max(1, _ceil_div(k1_128, tk1_max))
        self._tk1 = _round_up(_ceil_div(k1_128, nk), 128)
        self._k1p = nk * self._tk1
        self._n1p = _round_up(hidden1, 128)
        self._n2p = _round_up(num_hiddens, 128)

        # Zero-pad the weights ONCE at init (zero padding keeps the math exact;
        # padded hidden columns produce relu(0)=0 and contribute nothing).
        self._w1p = jnp.zeros((self._k1p, self._n1p), jnp.bfloat16
                              ).at[:num_genes, :hidden1].set(self.w1_t)
        self._b1p = jnp.zeros((1, self._n1p), jnp.float32
                              ).at[0, :hidden1].set(self.b1)
        self._w2p = jnp.zeros((self._n1p, self._n2p), jnp.bfloat16
                              ).at[:hidden1, :num_hiddens].set(self.w2_t)
        self._b2p = jnp.zeros((1, self._n2p), jnp.float32
                              ).at[0, :num_hiddens].set(self.b2)

    def __call__(self, x):
        B, K = x.shape
        assert K == self.num_genes
        # Batch tiling: one block for small batches, <= tb_max-row blocks for
        # large ones (leading "parallel" grid axis; bounds VMEM growth).
        nb = max(1, _ceil_div(B, self._tb_max))
        tb = _round_up(_ceil_div(B, nb), 8)
        Bp = nb * tb
        # Pad AND cast to bf16 here: halves the activation DMA bytes and
        # removes any per-tile cast inside the kernel.
        x_pad = jnp.zeros((Bp, self._k1p), jnp.bfloat16
                          ).at[:B, :K].set(x.astype(jnp.bfloat16))
        out = mlp_encoder_fused(x_pad, self._w1p, self._b1p,
                                self._w2p, self._b2p,
                                tb=tb, tk1=self._tk1)
        return out[:B, :self.num_hiddens]


def reference_forward(x, model):
    # Mirrors the kernel arithmetic: bf16 weights, bf16-cast activations,
    # f32 accumulation, bias + ReLU per layer, Dropout(p=0) identity.
    xb = x.astype(jnp.bfloat16).astype(jnp.float32)
    h = jnp.maximum(xb @ model.w1_t.astype(jnp.float32) + model.b1, 0.0)
    hb = h.astype(jnp.bfloat16).astype(jnp.float32)
    return jnp.maximum(hb @ model.w2_t.astype(jnp.float32) + model.b2, 0.0)


if __name__ == "__main__":
    # Small shapes consistent with the module: x (batch, num_genes) -> (batch, num_hiddens).
    # batch=6 and num_genes=500 are deliberately NOT tile multiples to exercise
    # the padding path (real model: num_genes=10000, hidden 1024, num_hiddens=128).
    batch = 6
    num_genes = 500
    num_hiddens = 128

    key = jax.random.PRNGKey(0)
    kx, kp = jax.random.split(key)
    x = jax.random.normal(kx, (batch, num_genes), dtype=jnp.float32)

    model = MLPEncoderPallas(num_genes, num_hiddens, kp)  # hidden1=1024 as in the module

    out = jax.block_until_ready(model(x))
    ref = reference_forward(x, model)

    assert out.shape == (batch, num_hiddens)
    assert jnp.allclose(out, ref, atol=2e-3, rtol=2e-3), "mismatch vs reference"

    print("KERNEL_OK")
</pallas_src>

<mosaic_0001>
module attributes {stable_mosaic.version = 11 : i64} {
  func.func @_mlp_fused_kernel(%arg0: i32, %arg1: i32, %arg2: memref<8x512xbf16, #tpu.memory_space<vmem>>, %arg3: memref<512x1024xbf16, #tpu.memory_space<vmem>>, %arg4: memref<1x1024xf32, #tpu.memory_space<vmem>>, %arg5: memref<1024x128xbf16, #tpu.memory_space<vmem>>, %arg6: memref<1x128xf32, #tpu.memory_space<vmem>>, %arg7: memref<8x128xf32, #tpu.memory_space<vmem>>, %arg8: memref<8x1024xf32, #tpu.memory_space<vmem>>) attributes {dimension_semantics = [#tpu.dimension_semantics<parallel>, #tpu.dimension_semantics<arbitrary>], iteration_bounds = array<i64: 1, 1>, scalar_prefetch = 0 : i64, scratch_operands = 1 : i64, tpu.core_type = #tpu.core_type<tc>, window_params = [{transform_indices = @transform_0, window_bounds = array<i64: 8, 512>}, {transform_indices = @transform_1, window_bounds = array<i64: 512, 1024>}, {pipeline_mode = #tpu.pipeline_mode<synchronous>, transform_indices = @transform_2, window_bounds = array<i64: 1, 1024>}, {pipeline_mode = #tpu.pipeline_mode<synchronous>, transform_indices = @transform_3, window_bounds = array<i64: 1024, 128>}, {pipeline_mode = #tpu.pipeline_mode<synchronous>, transform_indices = @transform_4, window_bounds = array<i64: 1, 128>}, {transform_indices = @transform_5, window_bounds = array<i64: 8, 128>}]} {
    %c0_i32 = arith.constant 0 : i32
    %0 = arith.cmpi eq, %arg1, %c0_i32 : i32
    %1 = arith.extui %0 : i1 to i32
    %c0_i32_0 = arith.constant 0 : i32
    %2 = arith.cmpi ne, %1, %c0_i32_0 : i32
    scf.if %2 {
      %cst_10 = arith.constant 0.000000e+00 : f32
      %12 = vector.broadcast %cst_10 : f32 to vector<8x1024xf32>
      %c0_11 = arith.constant 0 : index
      %c0_12 = arith.constant 0 : index
      %13 = vector.load %arg8[%c0_11, %c0_12] : memref<8x1024xf32, #tpu.memory_space<vmem>>, vector<8x1024xf32>
      tpu.vector_store %arg8[%c0_11, %c0_12], %12 {strides = array<i32>} : memref<8x1024xf32, #tpu.memory_space<vmem>>, vector<8x1024xf32>,
    } else {
    }
    %c0 = arith.constant 0 : index
    %c0_1 = arith.constant 0 : index
    %3 = vector.load %arg8[%c0, %c0_1] : memref<8x1024xf32, #tpu.memory_space<vmem>>, vector<8x1024xf32>
    %c0_2 = arith.constant 0 : index
    %c0_3 = arith.constant 0 : index
    %4 = vector.load %arg2[%c0_2, %c0_3] : memref<8x512xbf16, #tpu.memory_space<vmem>>, vector<8x512xbf16>
    %c0_4 = arith.constant 0 : index
    %c0_5 = arith.constant 0 : index
    %5 = vector.load %arg3[%c0_4, %c0_5] : memref<512x1024xbf16, #tpu.memory_space<vmem>>, vector<512x1024xbf16>
    %cst = arith.constant dense<0.000000e+00> : vector<8x1024xf32>
    %6 = tpu.matmul %4, %5, %cst {dimension_numbers = #tpu.dot_dimension_numbers<[1], [0], [0], [1], [0, 0, 1, 1], [], []>} : vector<8x512xbf16>, vector<512x1024xbf16>, vector<8x1024xf32> -> vector<8x1024xf32>
    %7 = arith.addf %3, %6 : vector<8x1024xf32>
    %c0_6 = arith.constant 0 : index
    %c0_7 = arith.constant 0 : index
    %8 = vector.load %arg8[%c0_6, %c0_7] : memref<8x1024xf32, #tpu.memory_space<vmem>>, vector<8x1024xf32>
    tpu.vector_store %arg8[%c0_6, %c0_7], %7 {strides = array<i32>} : memref<8x1024xf32, #tpu.memory_space<vmem>>, vector<8x1024xf32>,
    %c0_i32_8 = arith.constant 0 : i32
    %9 = arith.cmpi eq, %arg1, %c0_i32_8 : i32
    %10 = arith.extui %9 : i1 to i32
    %c0_i32_9 = arith.constant 0 : i32
    %11 = arith.cmpi ne, %10, %c0_i32_9 : i32
    scf.if %11 {
      %c0_10 = arith.constant 0 : index
      %c0_11 = arith.constant 0 : index
      %12 = vector.load %arg8[%c0_10, %c0_11] : memref<8x1024xf32, #tpu.memory_space<vmem>>, vector<8x1024xf32>
      %c0_12 = arith.constant 0 : index
      %c0_13 = arith.constant 0 : index
      %13 = vector.load %arg4[%c0_12, %c0_13] : memref<1x1024xf32, #tpu.memory_space<vmem>>, vector<1x1024xf32>
      %14 = vector.broadcast %13 : vector<1x1024xf32> to vector<8x1024xf32>
      %15 = arith.addf %12, %14 : vector<8x1024xf32>
      %cst_14 = arith.constant 0.000000e+00 : f32
      %16 = vector.broadcast %cst_14 : f32 to vector<8x1024xf32>
      %17 = arith.maximumf %15, %16 : vector<8x1024xf32>
      %18 = arith.truncf %17 : vector<8x1024xf32> to vector<8x1024xbf16>
      %c0_15 = arith.constant 0 : index
      %c0_16 = arith.constant 0 : index
      %19 = vector.load %arg5[%c0_15, %c0_16] : memref<1024x128xbf16, #tpu.memory_space<vmem>>, vector<1024x128xbf16>
      %cst_17 = arith.constant dense<0.000000e+00> : vector<8x128xf32>
      %20 = tpu.matmul %18, %19, %cst_17 {dimension_numbers = #tpu.dot_dimension_numbers<[1], [0], [0], [1], [0, 0, 1, 1], [], []>} : vector<8x1024xbf16>, vector<1024x128xbf16>, vector<8x128xf32> -> vector<8x128xf32>
      %c0_18 = arith.constant 0 : index
      %c0_19 = arith.constant 0 : index
      %21 = vector.load %arg6[%c0_18, %c0_19] : memref<1x128xf32, #tpu.memory_space<vmem>>, vector<1x128xf32>
      %22 = vector.broadcast %21 : vector<1x128xf32> to vector<8x128xf32>
      %23 = arith.addf %20, %22 : vector<8x128xf32>
      %cst_20 = arith.constant 0.000000e+00 : f32
      %24 = vector.broadcast %cst_20 : f32 to vector<8x128xf32>
      %25 = arith.maximumf %23, %24 : vector<8x128xf32>
      %c0_21 = arith.constant 0 : index
      %c0_22 = arith.constant 0 : index
      %26 = vector.load %arg7[%c0_21, %c0_22] : memref<8x128xf32, #tpu.memory_space<vmem>>, vector<8x128xf32>
      tpu.vector_store %arg7[%c0_21, %c0_22], %25 {strides = array<i32>} : memref<8x128xf32, #tpu.memory_space<vmem>>, vector<8x128xf32>,
    } else {
    }
    return
  }
  func.func @transform_0(%arg0: i32, %arg1: i32) -> (i32, i32) {
    %c0_i32 = arith.constant 0 : i32
    return %arg0, %arg1 : i32, i32
  }
  func.func @transform_1(%arg0: i32, %arg1: i32) -> (i32, i32) {
    %c0_i32 = arith.constant 0 : i32
    %c0_i32_0 = arith.constant 0 : i32
    return %arg1, %c0_i32 : i32, i32
  }
  func.func @transform_2(%arg0: i32, %arg1: i32) -> (i32, i32) {
    %c0_i32 = arith.constant 0 : i32
    %c0_i32_0 = arith.constant 0 : i32
    %c0_i32_1 = arith.constant 0 : i32
    return %c0_i32, %c0_i32_0 : i32, i32
  }
  func.func @transform_3(%arg0: i32, %arg1: i32) -> (i32, i32) {
    %c0_i32 = arith.constant 0 : i32
    %c0_i32_0 = arith.constant 0 : i32
    %c0_i32_1 = arith.constant 0 : i32
    return %c0_i32, %c0_i32_0 : i32, i32
  }
  func.func @transform_4(%arg0: i32, %arg1: i32) -> (i32, i32) {
    %c0_i32 = arith.constant 0 : i32
    %c0_i32_0 = arith.constant 0 : i32
    %c0_i32_1 = arith.constant 0 : i32
    return %c0_i32, %c0_i32_0 : i32, i32
  }
  func.func @transform_5(%arg0: i32, %arg1: i32) -> (i32, i32) {
    %c0_i32 = arith.constant 0 : i32
    %c0_i32_0 = arith.constant 0 : i32
    return %arg0, %c0_i32 : i32, i32
  }
}

</mosaic_0001>

<bundles_post_ra>
// kernel: tpu_custom_call.1
= control target key start
LH: loop header
LB: loop body
LE: loop exit
PB: predicated region body
PF: predicated region fallthrough
CT: control target
= control target key end

     0   :  { %10 = vsyncpa [#allocation4], 0  ;;  %s4641_s0 = inlined_call_operand.hbm [shape: bf16[8,512], index: 0, kind: input, shape index: {}]   ;;  %s4642_s1 = inlined_call_operand.hbm [shape: bf16[512,1024], index: 1, kind: input, shape index: {}]   ;;  %s4643_s2 = inlined_call_operand.hbm [shape: f32[1,1024], index: 2, kind: input, shape index: {}]   ;;  %s4644_s3 = inlined_call_operand.hbm [shape: bf16[1024,128], index: 3, kind: input, shape index: {}]   ;;  %s4645_s4 = inlined_call_operand.vmem [shape: f32[1,128], index: 4, kind: input, shape index: {}]   ;;  %s4646_s5 = inlined_call_operand.hbm [shape: f32[8,128], index: 5, kind: output, shape index: {}]  }
   0x1   :  { %11 = vsyncpa [#allocation7], 0 }
   0x2   :  { %12 = vsyncpa [#allocation10], 0  ;;  %s29_s20 = sshll.u32 %s4642_s1, 4  ;;  %s30_s20 = int_to_ptr.hbm [resolvable:$true] %s29_s20 }
   0x3   :  { %13 = vsyncpa [#allocation5], 0  ;;  %s4516_s21 = smov [#allocation6]   ;;  %s19_s25 = sshll.u32 %s4641_s0, 4  ;;  %s20_s25 = int_to_ptr.hbm [resolvable:$true] %s19_s25 }
   0x4   :  { %s31_s22 = sshll.u32 %s4516_s21, 4  ;;  %s4517_s26 = smov 512   ;;  %s32_s22 = int_to_ptr.vmem [resolvable:$true] %s31_s22 }
   0x5   :  { %s4518_s27 = smov 32   ;;  %s4519_s28 = smov [#allocation3]  }
   0x6   :  { %37 = dma.hbm_to_vmem [thread:$0]  %s30_s20, 32768, %s32_s22, [#allocation7], %s4517_s26, %s4517_s26, %s4518_s27  }
   0x7   :  { %s21_s29 = sshll.u32 %s4519_s28, 4  ;;  %s43_s7 = sshll.u32 %s4643_s2, 4  ;;  %s22_s29 = int_to_ptr.vmem [resolvable:$true] %s21_s29  ;;  %s44_s7 = int_to_ptr.hbm [resolvable:$true] %s43_s7 }
   0x8   :  { %24 = dma.hbm_to_vmem [thread:$0]  %s20_s25, 256, %s22_s29, [#allocation4]  }
   0x9   :  { %s53_s9 = sshll.u32 %s4644_s3, 4  ;;  %s4520_s10 = smov [#allocation8]   ;;  %s54_s9 = int_to_ptr.hbm [resolvable:$true] %s53_s9 }
   0xa   :  { %s45_s11 = sshll.u32 %s4520_s10, 4  ;;  %s4521_s0 = smov [#allocation9]   ;;  %s46_s11 = int_to_ptr.vmem [resolvable:$true] %s45_s11 }
   0xb   :  { %48 = dma.hbm_to_vmem [thread:$0]  %s44_s7, 128, %s46_s11, [#allocation7]  }
   0xc   :  { %s55_s12 = sshll.u32 %s4521_s0, 4  ;;  %s4522_s13 = smov 64   ;;  %s56_s12 = int_to_ptr.vmem [resolvable:$true] %s55_s12 }
   0xd   :  { %s4523_s14 = smov 4  }
   0xe   :  { %61 = dma.hbm_to_vmem [thread:$0]  %s54_s9, 8192, %s56_s12, [#allocation10], %s4522_s13, %s4522_s13, %s4523_s14  }
   0xf   :  { %4508 = dma.done.wait [#allocation4], 256  }
  0x10   :  { %4509 = vsyncadd [#allocation4], 4294967040 }
  0x11   :  { %4510 = dma.done.wait [#allocation7], 32896  }
  0x12   :  { %4511 = vsyncadd [#allocation7], 4294934400 }
  0x13   :  { %4512 = dma.done.wait [#allocation10], 8192  }
  0x14   :  { %4513 = vsyncadd [#allocation10], 4294959104  ;;  %v3004_v0 = vld [vmem:[#allocation6 + $0x1c0] sm:$0xf]  ;;  %s2766_s18 = sshll.u32 %s4646_s5, 4  ;;  %s2767_s18 = int_to_ptr.hbm [resolvable:$true] %s2766_s18 }
  0x15   :  { %v4118_v1 = vld [vmem:[#allocation6 + $0x1dc] sm:$0xf0] }
  0x16   :  { %v3260_v2 = vld [vmem:[#allocation6 + $0x3c0] sm:$0xf]  ;;  %v3005_v3 = vor.u32 %v4118_v1, %v3004_v0 }
  0x17   :  { %v4182_v4 = vld [vmem:[#allocation6 + $0x3dc] sm:$0xf0] }
  0x18   :  { %v3516_v5 = vld [vmem:[#allocation6 + $0x5c0] sm:$0xf]  ;;  %v3261_v7 = vor.u32 %v4182_v4, %v3260_v2  ;;  %1652 = vmatpush.bf16.msra.mxu0 %v3005_v3 }
  0x19   :  { %v4246_v6 = vld [vmem:[#allocation6 + $0x5dc] sm:$0xf0] }
  0x1a   :  { %v3517_v8 = vor.u32 %v4246_v6, %v3516_v5  ;;  %v3772_v9 = vld [vmem:[#allocation6 + $0x7c0] sm:$0xf]  ;;  %1665 = vmatpush.bf16.msra.mxu1 %v3261_v7 }
  0x1b   :  { %v4310_v10 = vld [vmem:[#allocation6 + $0x7dc] sm:$0xf0] }
  0x1c   :  { %v2972_v11 = vld [vmem:[#allocation6 + $0x180] sm:$0xf]  ;;  %v3773_v12 = vor.u32 %v4310_v10, %v3772_v9  ;;  %1678 = vmatpush.bf16.msra.mxu2 %v3517_v8 }
  0x1d   :  { %v4110_v13 = vld [vmem:[#allocation6 + $0x19c] sm:$0xf0] }
  0x1e   :  { %v3228_v14 = vld [vmem:[#allocation6 + $0x380] sm:$0xf]  ;;  %v2973_v16 = vor.u32 %v4110_v13, %v2972_v11  ;;  %1691 = vmatpush.bf16.msra.mxu3 %v3773_v12 }
  0x1f   :  { %v4174_v15 = vld [vmem:[#allocation6 + $0x39c] sm:$0xf0] }
  0x20   :  { %v3229_v17 = vor.u32 %v4174_v15, %v3228_v14  ;;  %v3484_v18 = vld [vmem:[#allocation6 + $0x580] sm:$0xf]  ;;  %1653 = vmatpush.bf16.msra.mxu0 %v2973_v16 }
  0x21   :  { %v4238_v19 = vld [vmem:[#allocation6 + $0x59c] sm:$0xf0] }
  0x22   :  { %v3740_v20 = vld [vmem:[#allocation6 + $0x780] sm:$0xf]  ;;  %v3485_v21 = vor.u32 %v4238_v19, %v3484_v18  ;;  %1666 = vmatpush.bf16.msra.mxu1 %v3229_v17 }
  0x23   :  { %v4302_v22 = vld [vmem:[#allocation6 + $0x79c] sm:$0xf0] }
  0x24   :  { %v2940_v23 = vld [vmem:[#allocation6 + $0x140] sm:$0xf]  ;;  %v3741_v25 = vor.u32 %v4302_v22, %v3740_v20  ;;  %1679 = vmatpush.bf16.msra.mxu2 %v3485_v21 }
  0x25   :  { %v4102_v24 = vld [vmem:[#allocation6 + $0x15c] sm:$0xf0] }
  0x26   :  { %v3196_v26 = vld [vmem:[#allocation6 + $0x340] sm:$0xf]  ;;  %v2941_v29 = vor.u32 %v4102_v24, %v2940_v23  ;;  %1692 = vmatpush.bf16.msra.mxu3 %v3741_v25 }
  0x27   :  { %v4166_v27 = vld [vmem:[#allocation6 + $0x35c] sm:$0xf0] }
  0x28   :  { %v3452_v28 = vld [vmem:[#allocation6 + $0x540] sm:$0xf]  ;;  %v3197_v33 = vor.u32 %v4166_v27, %v3196_v26  ;;  %1654 = vmatpush.bf16.msra.mxu0 %v2941_v29  ;;  %v3006_v29 = vld [vmem:[#allocation6 + $0x1e0] sm:$0xf0] }
  0x29   :  { %v4230_v30 = vld [vmem:[#allocation6 + $0x55c] sm:$0xf0] }
  0x2a   :  { %v3708_v31 = vld [vmem:[#allocation6 + $0x740] sm:$0xf]  ;;  %v3453_v34 = vor.u32 %v4230_v30, %v3452_v28  ;;  %1667 = vmatpush.bf16.msra.mxu1 %v3197_v33  ;;  %v4114_v28 = vld [vmem:[#allocation6 + $0x1c4] sm:$0xf] }
  0x2b   :  { %v4294_v32 = vld [vmem:[#allocation6 + $0x75c] sm:$0xf0]  ;;  %v4178_v30 = vld [vmem:[#allocation6 + $0x3c4] sm:$0xf] }
  0x2c   :  { %v2908_v35 = vld [vmem:[#allocation6 + $0x100] sm:$0xf]  ;;  %v3709_v38 = vor.u32 %v4294_v32, %v3708_v31  ;;  %1680 = vmatpush.bf16.msra.mxu2 %v3453_v34  ;;  %v3262_v32 = vld [vmem:[#allocation6 + $0x3e0] sm:$0xf0] }
  0x2d   :  { %v4094_v36 = vld [vmem:[#allocation6 + $0x11c] sm:$0xf0]  ;;  %v4242_v33 = vld [vmem:[#allocation6 + $0x5c4] sm:$0xf] }
  0x2e   :  { %v3164_v37 = vld [vmem:[#allocation6 + $0x300] sm:$0xf]  ;;  %v2909_v44 = vor.u32 %v4094_v36, %v2908_v35  ;;  %1693 = vmatpush.bf16.msra.mxu3 %v3709_v38  ;;  %v3518_v34 = vld [vmem:[#allocation6 + $0x5e0] sm:$0xf0] }
  0x2f   :  { %v4158_v39 = vld [vmem:[#allocation6 + $0x31c] sm:$0xf0]  ;;  %v3774_v38 = vld [vmem:[#allocation6 + $0x7e0] sm:$0xf0] }
  0x30   :  { %v3420_v40 = vld [vmem:[#allocation6 + $0x500] sm:$0xf]  ;;  %v3165_v45 = vor.u32 %v4158_v39, %v3164_v37  ;;  %1655 = vmatpush.bf16.msra.mxu0 %v2909_v44  ;;  %v4306_v37 = vld [vmem:[#allocation6 + $0x7c4] sm:$0xf] }
  0x31   :  { %v4222_v41 = vld [vmem:[#allocation6 + $0x51c] sm:$0xf0]  ;;  %v2974_v44 = vld [vmem:[#allocation6 + $0x1a0] sm:$0xf0] }
  0x32   :  { %v3676_v42 = vld [vmem:[#allocation6 + $0x700] sm:$0xf]  ;;  %v3421_v46 = vor.u32 %v4222_v41, %v3420_v40  ;;  %1668 = vmatpush.bf16.msra.mxu1 %v3165_v45  ;;  %v3009_v40 = vor.u32 %v4114_v28, %v3006_v29  ;;  %v3265_v41 = vor.u32 %v4178_v30, %v3262_v32  ;;  %v4170_v45 = vld [vmem:[#allocation6 + $0x384] sm:$0xf] }
  0x33   :  { %v4286_v43 = vld [vmem:[#allocation6 + $0x71c] sm:$0xf0]  ;;  %v4210_v28 = vld [vmem:[#allocation6 + $0x4c4] sm:$0xf] }
  0x34   :  { %v2876_v47 = vld [vmem:[#allocation6 + $0xc0] sm:$0xf]  ;;  %v3677_v50 = vor.u32 %v4286_v43, %v3676_v42  ;;  %1681 = vmatpush.bf16.msra.mxu2 %v3421_v46  ;;  %v3521_v42 = vor.u32 %v4242_v33, %v3518_v34  ;;  %v4106_v43 = vld [vmem:[#allocation6 + $0x184] sm:$0xf]  ;;  %v3777_v46 = vor.u32 %v4306_v37, %v3774_v38 }
  0x35   :  { %v4086_v48 = vld [vmem:[#allocation6 + $0xdc] sm:$0xf0]  ;;  %v3390_v29 = vld [vmem:[#allocation6 + $0x4e0] sm:$0xf0] }
  0x36   :  { %v3132_v49 = vld [vmem:[#allocation6 + $0x2c0] sm:$0xf]  ;;  %v2877_v56 = vor.u32 %v4086_v48, %v2876_v47  ;;  %1694 = vmatpush.bf16.msra.mxu3 %v3677_v50  ;;  %v3230_v47 = vld [vmem:[#allocation6 + $0x3a0] sm:$0xf0] }
  0x37   :  { %v4150_v51 = vld [vmem:[#allocation6 + $0x2dc] sm:$0xf0]  ;;  %v4234_v48 = vld [vmem:[#allocation6 + $0x584] sm:$0xf] }
  0x38   :  { %v3388_v52 = vld [vmem:[#allocation6 + $0x4c0] sm:$0xf]  ;;  %v3133_v57 = vor.u32 %v4150_v51, %v3132_v49  ;;  %1656 = vmatpush.bf16.msra.mxu0 %v2877_v56  ;;  %v3486_v49 = vld [vmem:[#allocation6 + $0x5a0] sm:$0xf0] }
  0x39   :  { %v4214_v53 = vld [vmem:[#allocation6 + $0x4dc] sm:$0xf0]  ;;  %v4298_v50 = vld [vmem:[#allocation6 + $0x784] sm:$0xf] }
  0x3a   :  { %v3644_v54 = vld [vmem:[#allocation6 + $0x6c0] sm:$0xf]  ;;  %v3389_v58 = vor.u32 %v4214_v53, %v3388_v52  ;;  %1669 = vmatpush.bf16.msra.mxu1 %v3133_v57  ;;  %v3742_v51 = vld [vmem:[#allocation6 + $0x7a0] sm:$0xf0]  ;;  %v2977_v52 = vor.u32 %v4106_v43, %v2974_v44  ;;  %v3233_v53 = vor.u32 %v4170_v45, %v3230_v47 }
  0x3b   :  { %v4278_v55 = vld [vmem:[#allocation6 + $0x6dc] sm:$0xf0]  ;;  %v2942_v56 = vld [vmem:[#allocation6 + $0x160] sm:$0xf0] }
  0x3c   :  { %v2844_v59 = vld [vmem:[#allocation6 + $0x80] sm:$0xf]  ;;  %v3645_v62 = vor.u32 %v4278_v55, %v3644_v54  ;;  %1682 = vmatpush.bf16.msra.mxu2 %v3389_v58  ;;  %v3489_v54 = vor.u32 %v4234_v48, %v3486_v49  ;;  %v4098_v55 = vld [vmem:[#allocation6 + $0x144] sm:$0xf]  ;;  %v3745_v58 = vor.u32 %v4298_v50, %v3742_v51 }
  0x3d   :  { %v4078_v60 = vld [vmem:[#allocation6 + $0x9c] sm:$0xf0]  ;;  %v4162_v57 = vld [vmem:[#allocation6 + $0x344] sm:$0xf] }
  0x3e   :  { %v3100_v61 = vld [vmem:[#allocation6 + $0x280] sm:$0xf]  ;;  %v2845_v4 = vor.u32 %v4078_v60, %v2844_v59  ;;  %1695 = vmatpush.bf16.msra.mxu3 %v3645_v62  ;;  %v3198_v59 = vld [vmem:[#allocation6 + $0x360] sm:$0xf0] }
  0x3f   :  { %v4142_v63 = vld [vmem:[#allocation6 + $0x29c] sm:$0xf0]  ;;  %v4226_v60 = vld [vmem:[#allocation6 + $0x544] sm:$0xf] }
  0x40   :  { %v3356_v0 = vld [vmem:[#allocation6 + $0x480] sm:$0xf]  ;;  %v3101_v5 = vor.u32 %v4142_v63, %v3100_v61  ;;  %1657 = vmatpush.bf16.msra.mxu0 %v2845_v4  ;;  %v3454_v61 = vld [vmem:[#allocation6 + $0x560] sm:$0xf0] }
  0x41   :  { %v4206_v1 = vld [vmem:[#allocation6 + $0x49c] sm:$0xf0]  ;;  %v4290_v62 = vld [vmem:[#allocation6 + $0x744] sm:$0xf] }
  0x42   :  { %v3612_v2 = vld [vmem:[#allocation6 + $0x680] sm:$0xf]  ;;  %v3357_v6 = vor.u32 %v4206_v1, %v3356_v0  ;;  %1670 = vmatpush.bf16.msra.mxu1 %v3101_v5  ;;  %v3710_v63 = vld [vmem:[#allocation6 + $0x760] sm:$0xf0]  ;;  %v2945_v0 = vor.u32 %v4098_v55, %v2942_v56  ;;  %v101_v1 = vld [vmem:[#allocation3 + $0x8] sm:$0xff] }
  0x43   :  { %v4270_v3 = vld [vmem:[#allocation6 + $0x69c] sm:$0xf0]  ;;  %v4090_v4 = vld [vmem:[#allocation6 + $0x104] sm:$0xf] }
  0x44   :  { %v2812_v7 = vld [vmem:[#allocation6 + $0x40] sm:$0xf]  ;;  %v3613_v10 = vor.u32 %v4270_v3, %v3612_v2  ;;  %1683 = vmatpush.bf16.msra.mxu2 %v3357_v6  ;;  %v3201_v2 = vor.u32 %v4162_v57, %v3198_v59  ;;  %v3457_v3 = vor.u32 %v4226_v60, %v3454_v61  ;;  %v2910_v5 = vld [vmem:[#allocation6 + $0x120] sm:$0xf0] }
  0x45   :  { %v4070_v8 = vld [vmem:[#allocation6 + $0x5c] sm:$0xf0]  ;;  %v4154_v6 = vld [vmem:[#allocation6 + $0x304] sm:$0xf] }
  0x46   :  { %v3068_v9 = vld [vmem:[#allocation6 + $0x240] sm:$0xf]  ;;  %v2813_v16 = vor.u32 %v4070_v8, %v2812_v7  ;;  %1696 = vmatpush.bf16.msra.mxu3 %v3613_v10  ;;  %v362_v7 = vunpack.c.l.b16 %v101_v1  ;;  %v363_v8 = vunpack.c.h.b16 %v101_v1  ;;  %v3166_v10 = vld [vmem:[#allocation6 + $0x320] sm:$0xf0] }
  0x47   :  { %v4134_v11 = vld [vmem:[#allocation6 + $0x25c] sm:$0xf0]  ;;  %v4274_v32 = vld [vmem:[#allocation6 + $0x6c4] sm:$0xf] }
  0x48   :  { %v3324_v12 = vld [vmem:[#allocation6 + $0x440] sm:$0xf]  ;;  %v3069_v19 = vor.u32 %v4134_v11, %v3068_v9  ;;  %1658 = vmatpush.bf16.msra.mxu0 %v2813_v16  ;;  %v3713_v9 = vor.u32 %v4290_v62, %v3710_v63  ;;  %v4218_v11 = vld [vmem:[#allocation6 + $0x504] sm:$0xf]  ;;  %v4569_v16 = vpack.c.b16 %v363_v8, %v363_v8  ;;  %v3268_v8 = vld [vmem:[#allocation6 + $0x3c8] sm:$0xf] }
  0x49   :  { %v4198_v13 = vld [vmem:[#allocation6 + $0x45c] sm:$0xf0]  ;;  %v3646_v33 = vld [vmem:[#allocation6 + $0x6e0] sm:$0xf0] }
  0x4a   :  { %v3580_v14 = vld [vmem:[#allocation6 + $0x640] sm:$0xf]  ;;  %v3325_v20 = vor.u32 %v4198_v13, %v3324_v12  ;;  %1671 = vmatpush.bf16.msra.mxu1 %v3069_v19  ;;  %v3422_v12 = vld [vmem:[#allocation6 + $0x520] sm:$0xf0] }
  0x4b   :  { %v4262_v15 = vld [vmem:[#allocation6 + $0x65c] sm:$0xf0]  ;;  %v4282_v13 = vld [vmem:[#allocation6 + $0x704] sm:$0xf] }
  0x4c   :  { %v2780_v17 = vld [vmem:[#allocation6] sm:$0xf]  ;;  %v3581_v24 = vor.u32 %v4262_v15, %v3580_v14  ;;  %1684 = vmatpush.bf16.msra.mxu2 %v3325_v20  ;;  %v3678_v14 = vld [vmem:[#allocation6 + $0x720] sm:$0xf0]  ;;  %v4567_v15 = vpack.c.b16 %v362_v7, %v362_v7  ;;  %v4119_v7 = vld [vmem:[#allocation6 + $0x1e4] sm:$0xf0] }
  0x4d   :  { %v4062_v18 = vld [vmem:[#allocation6 + $0x1c] sm:$0xf0]  ;;  %v4074_v37 = vld [vmem:[#allocation6 + $0x84] sm:$0xf] }
  0x4e   :  { %v3036_v21 = vld [vmem:[#allocation6 + $0x200] sm:$0xf]  ;;  %v2781_v31 = vor.u32 %v4062_v18, %v2780_v17  ;;  %1697 = vmatpush.bf16.msra.mxu3 %v3581_v24  ;;  %v100_v17 = vld [vmem:[#allocation3] sm:$0xff]  ;;  %v2913_v18 = vor.u32 %v4090_v4, %v2910_v5  ;;  %v2878_v24 = vld [vmem:[#allocation6 + $0xe0] sm:$0xf0] }
  0x4f   :  { %v4126_v22 = vld [vmem:[#allocation6 + $0x21c] sm:$0xf0]  ;;  %v360_v19 = vunpack.c.l.b16 %v100_v17  ;;  %v361_v20 = vunpack.c.h.b16 %v100_v17  ;;  %v2846_v38 = vld [vmem:[#allocation6 + $0xa0] sm:$0xf0]  ;;  %v3780_v17 = vld [vmem:[#allocation6 + $0x7c8] sm:$0xf] }
  0x50   :  { %v3292_v23 = vld [vmem:[#allocation6 + $0x400] sm:$0xf]  ;;  %v3037_v35 = vor.u32 %v4126_v22, %v3036_v21  ;;  %1659 = vmatpush.bf16.msra.mxu0 %v2781_v31  ;;  %v3169_v21 = vor.u32 %v4154_v6, %v3166_v10  ;;  %v3425_v22 = vor.u32 %v4218_v11, %v3422_v12  ;;  %v3358_v43 = vld [vmem:[#allocation6 + $0x4a0] sm:$0xf0]  ;;  %v3012_v6 = vld [vmem:[#allocation6 + $0x1c8] sm:$0xf] }
  0x51   :  { %v4190_v25 = vld [vmem:[#allocation6 + $0x41c] sm:$0xf0]  ;;  %v4572_v30 = vpack.c.b16 %v360_v19, %v360_v19  ;;  %v4574_v31 = vpack.c.b16 %v361_v20, %v361_v20  ;;  %v4266_v44 = vld [vmem:[#allocation6 + $0x684] sm:$0xf]  ;;  %v4183_v10 = vld [vmem:[#allocation6 + $0x3e4] sm:$0xf0]  ;;  %v3013_v20 = vor.u32 %v4119_v7, %v3012_v6 }
  0x52   :  { %v3548_v26 = vld [vmem:[#allocation6 + $0x600] sm:$0xf]  ;;  %v3293_v36 = vor.u32 %v4190_v25, %v3292_v23  ;;  %1672 = vmatpush.bf16.msra.mxu1 %v3037_v35  ;;  %v4082_v23 = vld [vmem:[#allocation6 + $0xc4] sm:$0xf]  ;;  %v3524_v11 = vld [vmem:[#allocation6 + $0x5c8] sm:$0xf] }
  0x53   :  { %v4254_v27 = vld [vmem:[#allocation6 + $0x61c] sm:$0xf0]  ;;  %v4146_v25 = vld [vmem:[#allocation6 + $0x2c4] sm:$0xf]  ;;  %v2881_v34 = vor.u32 %v4082_v23, %v2878_v24  ;;  %1660 = vmatmul.bf16.vlgmr.msra.gmra.mxu0 %v4572_v30  ;;  %v4247_v12 = vld [vmem:[#allocation6 + $0x5e4] sm:$0xf0] }
  0x54   :  { %v3549_v39 = vor.u32 %v4254_v27, %v3548_v26  ;;  %1685 = vmatpush.bf16.msra.mxu2 %v3293_v36  ;;  %1704 = vmatpush.bf16.msrb.mxu0 %v3009_v40  ;;  %v3681_v26 = vor.u32 %v4282_v13, %v3678_v14  ;;  %v3134_v27 = vld [vmem:[#allocation6 + $0x2e0] sm:$0xf0]  ;;  %v3393_v36 = vor.u32 %v4210_v28, %v3390_v29  ;;  %v2980_v23 = vld [vmem:[#allocation6 + $0x188] sm:$0xf] }
  0x55   :  { %1673 = vmatmul.bf16.vlgmr.msra.gmra.mxu1 %v4574_v31  ;;  %v3137_v35 = vor.u32 %v4146_v25, %v3134_v27  ;;  %v3649_v40 = vor.u32 %v4274_v32, %v3646_v33  ;;  %v3614_v45 = vld [vmem:[#allocation6 + $0x6a0] sm:$0xf0]  ;;  %v4111_v24 = vld [vmem:[#allocation6 + $0x1a4] sm:$0xf0] }
  0x56   :  { %1698 = vmatpush.bf16.msra.mxu3 %v3549_v39  ;;  %1717 = vmatpush.bf16.msrb.mxu1 %v3265_v41  ;;  %v4138_v39 = vld [vmem:[#allocation6 + $0x284] sm:$0xf]  ;;  %v3236_v25 = vld [vmem:[#allocation6 + $0x388] sm:$0xf] }
  0x57   :  { %1686 = vmatmul.bf16.vlgmr.msra.gmra.mxu2 %v4567_v15  ;;  %v3102_v41 = vld [vmem:[#allocation6 + $0x2a0] sm:$0xf0]  ;;  %v4175_v27 = vld [vmem:[#allocation6 + $0x3a4] sm:$0xf0] }
  0x58   :  { %1730 = vmatpush.bf16.msrb.mxu2 %v3521_v42  ;;  %1705 = vmatpush.bf16.msrb.mxu0 %v2977_v52  ;;  %v4202_v42 = vld [vmem:[#allocation6 + $0x484] sm:$0xf]  ;;  %v3105_v47 = vor.u32 %v4138_v39, %v3102_v41  ;;  %v3617_v52 = vor.u32 %v4266_v44, %v3614_v45  ;;  %v3492_v28 = vld [vmem:[#allocation6 + $0x588] sm:$0xf] }
  0x59   :  { %1699 = vmatmul.bf16.vlgmr.msra.gmra.mxu3 %v4569_v16  ;;  %v3361_v48 = vor.u32 %v4202_v42, %v3358_v43  ;;  %v4066_v49 = vld [vmem:[#allocation6 + $0x44] sm:$0xf]  ;;  %v4239_v29 = vld [vmem:[#allocation6 + $0x5a4] sm:$0xf0] }
  0x5a   :  { %1743 = vmatpush.bf16.msrb.mxu3 %v3777_v46  ;;  %1718 = vmatpush.bf16.msrb.mxu1 %v3233_v53  ;;  %v2849_v46 = vor.u32 %v4074_v37, %v2846_v38  ;;  %v2814_v50 = vld [vmem:[#allocation6 + $0x60] sm:$0xf0]  ;;  %v3748_v32 = vld [vmem:[#allocation6 + $0x788] sm:$0xf] }
  0x5b   :  { %v4130_v51 = vld [vmem:[#allocation6 + $0x244] sm:$0xf]  ;;  %v4303_v33 = vld [vmem:[#allocation6 + $0x7a4] sm:$0xf0] }
  0x5c   :  { %1731 = vmatpush.bf16.msrb.mxu2 %v3489_v54  ;;  %1706 = vmatpush.bf16.msrb.mxu0 %v2945_v0  ;;  %v3070_v53 = vld [vmem:[#allocation6 + $0x260] sm:$0xf0]  ;;  %v2948_v37 = vld [vmem:[#allocation6 + $0x148] sm:$0xf] }
  0x5d   :  { %v4194_v54 = vld [vmem:[#allocation6 + $0x444] sm:$0xf]  ;;  %v3073_v61 = vor.u32 %v4130_v51, %v3070_v53  ;;  %v4103_v38 = vld [vmem:[#allocation6 + $0x164] sm:$0xf0] }
  0x5e   :  { %1744 = vmatpush.bf16.msrb.mxu3 %v3745_v58  ;;  %1719 = vmatpush.bf16.msrb.mxu1 %v3201_v2  ;;  %v3326_v55 = vld [vmem:[#allocation6 + $0x460] sm:$0xf0]  ;;  %v2817_v58 = vor.u32 %v4066_v49, %v2814_v50  ;;  %v3204_v39 = vld [vmem:[#allocation6 + $0x348] sm:$0xf] }
  0x5f   :  { %v4258_v56 = vld [vmem:[#allocation6 + $0x644] sm:$0xf]  ;;  %v3329_v62 = vor.u32 %v4194_v54, %v3326_v55  ;;  %v4167_v41 = vld [vmem:[#allocation6 + $0x364] sm:$0xf0] }
  0x60   :  { %1732 = vmatpush.bf16.msrb.mxu2 %v3457_v3  ;;  %1707 = vmatpush.bf16.msrb.mxu0 %v2913_v18  ;;  %v3582_v57 = vld [vmem:[#allocation6 + $0x660] sm:$0xf0]  ;;  %v4311_v18 = vld [vmem:[#allocation6 + $0x7e4] sm:$0xf0] }
  0x61   :  { %v4058_v59 = vld [vmem:[#allocation6 + $0x4] sm:$0xf]  ;;  %v3585_v2 = vor.u32 %v4258_v56, %v3582_v57  ;;  %v3460_v42 = vld [vmem:[#allocation6 + $0x548] sm:$0xf] }
  0x62   :  { %1745 = vmatpush.bf16.msrb.mxu3 %v3713_v9  ;;  %1720 = vmatpush.bf16.msrb.mxu1 %v3169_v21  ;;  %v2782_v60 = vld [vmem:[#allocation6 + $0x20] sm:$0xf0]  ;;  %v3269_v21 = vor.u32 %v4183_v10, %v3268_v8  ;;  %v4231_v43 = vld [vmem:[#allocation6 + $0x564] sm:$0xf0] }
  0x63   :  { %v4122_v63 = vld [vmem:[#allocation6 + $0x204] sm:$0xf]  ;;  %v2785_v9 = vor.u32 %v4058_v59, %v2782_v60  ;;  %v3716_v44 = vld [vmem:[#allocation6 + $0x748] sm:$0xf] }
  0x64   :  { %1733 = vmatpush.bf16.msrb.mxu2 %v3425_v22  ;;  %1708 = vmatpush.bf16.msrb.mxu0 %v2881_v34  ;;  %v3038_v0 = vld [vmem:[#allocation6 + $0x220] sm:$0xf0]  ;;  %v3525_v22 = vor.u32 %v4247_v12, %v3524_v11  ;;  %v2981_v34 = vor.u32 %v4111_v24, %v2980_v23  ;;  %v4295_v45 = vld [vmem:[#allocation6 + $0x764] sm:$0xf0] }
  0x65   :  { %v4186_v1 = vld [vmem:[#allocation6 + $0x404] sm:$0xf]  ;;  %v3041_v13 = vor.u32 %v4122_v63, %v3038_v0  ;;  %v2916_v49 = vld [vmem:[#allocation6 + $0x108] sm:$0xf] }
  0x66   :  { %1746 = vmatpush.bf16.msrb.mxu3 %v3681_v26  ;;  %1721 = vmatpush.bf16.msrb.mxu1 %v3137_v35  ;;  %v3294_v3 = vld [vmem:[#allocation6 + $0x420] sm:$0xf0]  ;;  %v3781_v26 = vor.u32 %v4311_v18, %v3780_v17  ;;  %v3237_v35 = vor.u32 %v4175_v27, %v3236_v25  ;;  %v4095_v50 = vld [vmem:[#allocation6 + $0x124] sm:$0xf0] }
  0x67   :  { %v4250_v4 = vld [vmem:[#allocation6 + $0x604] sm:$0xf]  ;;  %v3297_v14 = vor.u32 %v4186_v1, %v3294_v3  ;;  %v3172_v51 = vld [vmem:[#allocation6 + $0x308] sm:$0xf] }
  0x68   :  { %1734 = vmatpush.bf16.msrb.mxu2 %v3393_v36  ;;  %1709 = vmatpush.bf16.msrb.mxu0 %v2849_v46  ;;  %v3550_v5 = vld [vmem:[#allocation6 + $0x620] sm:$0xf0]  ;;  %v3493_v36 = vor.u32 %v4239_v29, %v3492_v28  ;;  %v2949_v46 = vor.u32 %v4103_v38, %v2948_v37  ;;  %v4159_v53 = vld [vmem:[#allocation6 + $0x324] sm:$0xf0] }
  0x69   :  { %v3553_v19 = vor.u32 %v4250_v4, %v3550_v5  ;;  %v3428_v54 = vld [vmem:[#allocation6 + $0x508] sm:$0xf]  ;;  %v3173_v59 = vor.u32 %v4159_v53, %v3172_v51  ;;  %v4243_v51 = vld [vmem:[#allocation6 + $0x5cc] sm:$0xf] }
  0x6a   :  { %1747 = vmatpush.bf16.msrb.mxu3 %v3649_v40  ;;  %1722 = vmatpush.bf16.msrb.mxu1 %v3105_v47  ;;  %v3749_v40 = vor.u32 %v4303_v33, %v3748_v32  ;;  %v3205_v47 = vor.u32 %v4167_v41, %v3204_v39  ;;  %v4223_v55 = vld [vmem:[#allocation6 + $0x524] sm:$0xf0] }
  0x6b   :  { %v3684_v56 = vld [vmem:[#allocation6 + $0x708] sm:$0xf]  ;;  %v3429_v60 = vor.u32 %v4223_v55, %v3428_v54  ;;  %v4307_v55 = vld [vmem:[#allocation6 + $0x7cc] sm:$0xf] }
  0x6c   :  { %1735 = vmatpush.bf16.msrb.mxu2 %v3361_v48  ;;  %1710 = vmatpush.bf16.msrb.mxu0 %v2817_v58  ;;  %v3461_v48 = vor.u32 %v4231_v43, %v3460_v42  ;;  %v4287_v57 = vld [vmem:[#allocation6 + $0x724] sm:$0xf0]  ;;  %v2917_v58 = vor.u32 %v4095_v50, %v2916_v49  ;;  %v3270_v50 = vld [vmem:[#allocation6 + $0x3e8] sm:$0xf0] }
  0x6d   :  { %v3140_v63 = vld [vmem:[#allocation6 + $0x2c8] sm:$0xf]  ;;  %v3685_v0 = vor.u32 %v4287_v57, %v3684_v56  ;;  %v3782_v56 = vld [vmem:[#allocation6 + $0x7e8] sm:$0xf0] }
  0x6e   :  { %1748 = vmatpush.bf16.msrb.mxu3 %v3617_v52  ;;  %1723 = vmatpush.bf16.msrb.mxu1 %v3073_v61  ;;  %v3717_v52 = vor.u32 %v4295_v45, %v3716_v44  ;;  %v2884_v61 = vld [vmem:[#allocation6 + $0xc8] sm:$0xf] }
  0x6f   :  { %v4151_v1 = vld [vmem:[#allocation6 + $0x2e4] sm:$0xf0] }
  0x70   :  { %1736 = vmatpush.bf16.msrb.mxu2 %v3329_v62  ;;  %1711 = vmatpush.bf16.msrb.mxu0 %v2785_v9  ;;  %v4087_v62 = vld [vmem:[#allocation6 + $0xe4] sm:$0xf0]  ;;  %v3141_v7 = vor.u32 %v4151_v1, %v3140_v63  ;;  %v4171_v63 = vld [vmem:[#allocation6 + $0x38c] sm:$0xf] }
  0x71   :  { %v4215_v3 = vld [vmem:[#allocation6 + $0x4e4] sm:$0xf0]  ;;  %v2885_v6 = vor.u32 %v4087_v62, %v2884_v61  ;;  %v4107_v61 = vld [vmem:[#allocation6 + $0x18c] sm:$0xf] }
  0x72   :  { %1749 = vmatpush.bf16.msrb.mxu3 %v3585_v2  ;;  %1724 = vmatpush.bf16.msrb.mxu1 %v3041_v13  ;;  %v3396_v2 = vld [vmem:[#allocation6 + $0x4c8] sm:$0xf]  ;;  %v2982_v62 = vld [vmem:[#allocation6 + $0x1a8] sm:$0xf0] }
  0x73   :  { %1712 = vmatmul.bf16.vlgmr.msrb.gmra.mxu0 %v4572_v30  ;;  %v3652_v4 = vld [vmem:[#allocation6 + $0x6c8] sm:$0xf]  ;;  %v3397_v8 = vor.u32 %v4215_v3, %v3396_v2  ;;  %v3238_v1 = vld [vmem:[#allocation6 + $0x3a8] sm:$0xf0] }
  0x74   :  { %1737 = vmatpush.bf16.msrb.mxu2 %v3297_v14  ;;  %1756 = vmatpush.bf16.msra.mxu0 %v3013_v20  ;;  %v4279_v5 = vld [vmem:[#allocation6 + $0x6e4] sm:$0xf0]  ;;  %v4235_v2 = vld [vmem:[#allocation6 + $0x58c] sm:$0xf] }
  0x75   :  { %1725 = vmatmul.bf16.vlgmr.msrb.gmra.mxu1 %v4574_v31  ;;  %v2852_v9 = vld [vmem:[#allocation6 + $0x88] sm:$0xf]  ;;  %v3653_v12 = vor.u32 %v4279_v5, %v3652_v4  ;;  %v3494_v3 = vld [vmem:[#allocation6 + $0x5a8] sm:$0xf0] }
  0x76   :  { %1750 = vmatpush.bf16.msrb.mxu3 %v3553_v19  ;;  %1769 = vmatpush.bf16.msra.mxu1 %v3269_v21  ;;  %v4079_v10 = vld [vmem:[#allocation6 + $0xa4] sm:$0xf0]  ;;  %v4299_v4 = vld [vmem:[#allocation6 + $0x78c] sm:$0xf] }
  0x77   :  { %1738 = vmatmul.bf16.vlgmr.msrb.gmra.mxu2 %v4567_v15  ;;  %v3108_v11 = vld [vmem:[#allocation6 + $0x288] sm:$0xf]  ;;  %v2853_v20 = vor.u32 %v4079_v10, %v2852_v9  ;;  %v3750_v5 = vld [vmem:[#allocation6 + $0x7a8] sm:$0xf0] }
  0x78   :  { %1782 = vmatpush.bf16.msra.mxu2 %v3525_v22  ;;  %1757 = vmatpush.bf16.msra.mxu0 %v2981_v34  ;;  %v4143_v13 = vld [vmem:[#allocation6 + $0x2a4] sm:$0xf0]  ;;  %v4099_v9 = vld [vmem:[#allocation6 + $0x14c] sm:$0xf] }
  0x79   :  { %1751 = vmatmul.bf16.vlgmr.msrb.gmra.mxu3 %v4569_v16  ;;  %v3364_v14 = vld [vmem:[#allocation6 + $0x488] sm:$0xf]  ;;  %v3109_v21 = vor.u32 %v4143_v13, %v3108_v11  ;;  %v2950_v10 = vld [vmem:[#allocation6 + $0x168] sm:$0xf0] }
  0x7a   :  { %1795 = vmatpush.bf16.msra.mxu3 %v3781_v26  ;;  %1770 = vmatpush.bf16.msra.mxu1 %v3237_v35  ;;  %v4207_v17 = vld [vmem:[#allocation6 + $0x4a4] sm:$0xf0]  ;;  %v4163_v11 = vld [vmem:[#allocation6 + $0x34c] sm:$0xf] }
  0x7b   :  { %v3620_v18 = vld [vmem:[#allocation6 + $0x688] sm:$0xf]  ;;  %v3365_v22 = vor.u32 %v4207_v17, %v3364_v14  ;;  %v3206_v13 = vld [vmem:[#allocation6 + $0x368] sm:$0xf0] }
  0x7c   :  { %1783 = vmatpush.bf16.msra.mxu2 %v3493_v36  ;;  %1758 = vmatpush.bf16.msra.mxu0 %v2949_v46  ;;  %v4271_v19 = vld [vmem:[#allocation6 + $0x6a4] sm:$0xf0]  ;;  %v4115_v46 = vld [vmem:[#allocation6 + $0x1cc] sm:$0xf] }
  0x7d   :  { %v2820_v23 = vld [vmem:[#allocation6 + $0x48] sm:$0xf]  ;;  %v3621_v26 = vor.u32 %v4271_v19, %v3620_v18  ;;  %v4227_v14 = vld [vmem:[#allocation6 + $0x54c] sm:$0xf] }
  0x7e   :  { %1796 = vmatpush.bf16.msra.mxu3 %v3749_v40  ;;  %1771 = vmatpush.bf16.msra.mxu1 %v3205_v47  ;;  %v4071_v24 = vld [vmem:[#allocation6 + $0x64] sm:$0xf0]  ;;  %v3014_v47 = vld [vmem:[#allocation6 + $0x1e8] sm:$0xf0] }
  0x7f   :  { %v3076_v25 = vld [vmem:[#allocation6 + $0x248] sm:$0xf]  ;;  %v2821_v34 = vor.u32 %v4071_v24, %v2820_v23  ;;  %v3462_v17 = vld [vmem:[#allocation6 + $0x568] sm:$0xf0] }
  0x80   :  { %1784 = vmatpush.bf16.msra.mxu2 %v3461_v48  ;;  %1759 = vmatpush.bf16.msra.mxu0 %v2917_v58  ;;  %v4135_v27 = vld [vmem:[#allocation6 + $0x264] sm:$0xf0]  ;;  %v4179_v48 = vld [vmem:[#allocation6 + $0x3cc] sm:$0xf]  ;;  %v3017_v58 = vor.u32 %v4115_v46, %v3014_v47 }
  0x81   :  { %v3332_v28 = vld [vmem:[#allocation6 + $0x448] sm:$0xf]  ;;  %v3077_v37 = vor.u32 %v4135_v27, %v3076_v25  ;;  %v4291_v18 = vld [vmem:[#allocation6 + $0x74c] sm:$0xf] }
  0x82   :  { %1797 = vmatpush.bf16.msra.mxu3 %v3717_v52  ;;  %1772 = vmatpush.bf16.msra.mxu1 %v3173_v59  ;;  %v4199_v29 = vld [vmem:[#allocation6 + $0x464] sm:$0xf0]  ;;  %v3526_v52 = vld [vmem:[#allocation6 + $0x5e8] sm:$0xf0]  ;;  %v3273_v59 = vor.u32 %v4179_v48, %v3270_v50 }
  0x83   :  { %v3588_v32 = vld [vmem:[#allocation6 + $0x648] sm:$0xf]  ;;  %v3333_v38 = vor.u32 %v4199_v29, %v3332_v28  ;;  %v3718_v19 = vld [vmem:[#allocation6 + $0x768] sm:$0xf0] }
  0x84   :  { %1785 = vmatpush.bf16.msra.mxu2 %v3429_v60  ;;  %1760 = vmatpush.bf16.msra.mxu0 %v2885_v6  ;;  %v4263_v33 = vld [vmem:[#allocation6 + $0x664] sm:$0xf0]  ;;  %v3529_v60 = vor.u32 %v4243_v51, %v3526_v52  ;;  %v2985_v6 = vor.u32 %v4107_v61, %v2982_v62  ;;  %v4091_v23 = vld [vmem:[#allocation6 + $0x10c] sm:$0xf] }
  0x85   :  { %v2788_v35 = vld [vmem:[#allocation6 + $0x8] sm:$0xf]  ;;  %v3589_v42 = vor.u32 %v4263_v33, %v3588_v32  ;;  %v2918_v24 = vld [vmem:[#allocation6 + $0x128] sm:$0xf0] }
  0x86   :  { %1798 = vmatpush.bf16.msra.mxu3 %v3685_v0  ;;  %1773 = vmatpush.bf16.msra.mxu1 %v3141_v7  ;;  %v4063_v36 = vld [vmem:[#allocation6 + $0x24] sm:$0xf0]  ;;  %v3785_v0 = vor.u32 %v4307_v55, %v3782_v56  ;;  %v3241_v7 = vor.u32 %v4171_v63, %v3238_v1  ;;  %v4155_v25 = vld [vmem:[#allocation6 + $0x30c] sm:$0xf] }
  0x87   :  { %v3044_v39 = vld [vmem:[#allocation6 + $0x208] sm:$0xf]  ;;  %v2789_v49 = vor.u32 %v4063_v36, %v2788_v35  ;;  %v3174_v27 = vld [vmem:[#allocation6 + $0x328] sm:$0xf0] }
  0x88   :  { %1786 = vmatpush.bf16.msra.mxu2 %v3397_v8  ;;  %1761 = vmatpush.bf16.msra.mxu0 %v2853_v20  ;;  %v4127_v40 = vld [vmem:[#allocation6 + $0x224] sm:$0xf0]  ;;  %v3497_v8 = vor.u32 %v4235_v2, %v3494_v3  ;;  %v2953_v20 = vor.u32 %v4099_v9, %v2950_v10  ;;  %v4219_v28 = vld [vmem:[#allocation6 + $0x50c] sm:$0xf]  ;;  %v3177_v35 = vor.u32 %v4155_v25, %v3174_v27  ;;  %v3532_v25 = vld [vmem:[#allocation6 + $0x5d0] sm:$0xf] }
  0x89   :  { %v3300_v41 = vld [vmem:[#allocation6 + $0x408] sm:$0xf]  ;;  %v3045_v53 = vor.u32 %v4127_v40, %v3044_v39  ;;  %v3430_v29 = vld [vmem:[#allocation6 + $0x528] sm:$0xf0] }
  0x8a   :  { %1799 = vmatpush.bf16.msra.mxu3 %v3653_v12  ;;  %1774 = vmatpush.bf16.msra.mxu1 %v3109_v21  ;;  %v4191_v43 = vld [vmem:[#allocation6 + $0x424] sm:$0xf0]  ;;  %v3753_v12 = vor.u32 %v4299_v4, %v3750_v5  ;;  %v3209_v21 = vor.u32 %v4163_v11, %v3206_v13  ;;  %v4283_v32 = vld [vmem:[#allocation6 + $0x70c] sm:$0xf]  ;;  %v3433_v36 = vor.u32 %v4219_v28, %v3430_v29  ;;  %v3788_v29 = vld [vmem:[#allocation6 + $0x7d0] sm:$0xf] }
  0x8b   :  { %v3556_v44 = vld [vmem:[#allocation6 + $0x608] sm:$0xf]  ;;  %v3301_v54 = vor.u32 %v4191_v43, %v3300_v41  ;;  %v3686_v33 = vld [vmem:[#allocation6 + $0x728] sm:$0xf0] }
  0x8c   :  { %1787 = vmatpush.bf16.msra.mxu2 %v3365_v22  ;;  %v4255_v45 = vld [vmem:[#allocation6 + $0x624] sm:$0xf0]  ;;  %1762 = vmatpush.bf16.msra.mxu0 %v2821_v34  ;;  %v3465_v22 = vor.u32 %v4227_v14, %v3462_v17  ;;  %v2921_v34 = vor.u32 %v4091_v23, %v2918_v24  ;;  %v4147_v39 = vld [vmem:[#allocation6 + $0x2cc] sm:$0xf]  ;;  %v3689_v40 = vor.u32 %v4283_v32, %v3686_v33  ;;  %v4184_v24 = vld [vmem:[#allocation6 + $0x3ec] sm:$0xf0] }
  0x8d   :  { %v3557_v57 = vor.u32 %v4255_v45, %v3556_v44  ;;  %v3142_v41 = vld [vmem:[#allocation6 + $0x2e8] sm:$0xf0]  ;;  %v4312_v32 = vld [vmem:[#allocation6 + $0x7ec] sm:$0xf0] }
  0x8e   :  { %1800 = vmatpush.bf16.msra.mxu3 %v3621_v26  ;;  %1775 = vmatpush.bf16.msra.mxu1 %v3077_v37  ;;  %v3721_v26 = vor.u32 %v4291_v18, %v3718_v19  ;;  %v4083_v37 = vld [vmem:[#allocation6 + $0xcc] sm:$0xf]  ;;  %v3145_v47 = vor.u32 %v4147_v39, %v3142_v41  ;;  %v3244_v39 = vld [vmem:[#allocation6 + $0x390] sm:$0xf] }
  0x8f   :  { %v3398_v43 = vld [vmem:[#allocation6 + $0x4e8] sm:$0xf0]  ;;  %v4176_v41 = vld [vmem:[#allocation6 + $0x3ac] sm:$0xf0] }
  0x90   :  { %1788 = vmatpush.bf16.msra.mxu2 %v3333_v38  ;;  %1763 = vmatpush.bf16.msra.mxu0 %v2789_v49  ;;  %v2886_v38 = vld [vmem:[#allocation6 + $0xe8] sm:$0xf0] }
  0x91   :  { %v4275_v44 = vld [vmem:[#allocation6 + $0x6cc] sm:$0xf]  ;;  %v2889_v46 = vor.u32 %v4083_v37, %v2886_v38  ;;  %v2988_v37 = vld [vmem:[#allocation6 + $0x190] sm:$0xf] }
  0x92   :  { %1801 = vmatpush.bf16.msra.mxu3 %v3589_v42  ;;  %1776 = vmatpush.bf16.msra.mxu1 %v3045_v53  ;;  %v4211_v42 = vld [vmem:[#allocation6 + $0x4cc] sm:$0xf]  ;;  %v4112_v38 = vld [vmem:[#allocation6 + $0x1ac] sm:$0xf0] }
  0x93   :  { %1764 = vmatmul.bf16.vlgmr.msra.gmra.mxu0 %v4572_v30  ;;  %v3654_v45 = vld [vmem:[#allocation6 + $0x6e8] sm:$0xf0]  ;;  %v3401_v48 = vor.u32 %v4211_v42, %v3398_v43  ;;  %v3500_v42 = vld [vmem:[#allocation6 + $0x590] sm:$0xf] }
  0x94   :  { %1789 = vmatpush.bf16.msra.mxu2 %v3301_v54  ;;  %1808 = vmatpush.bf16.msrb.mxu0 %v3017_v58  ;;  %v4075_v49 = vld [vmem:[#allocation6 + $0x8c] sm:$0xf]  ;;  %v3657_v52 = vor.u32 %v4275_v44, %v3654_v45  ;;  %v4240_v43 = vld [vmem:[#allocation6 + $0x5ac] sm:$0xf0] }
  0x95   :  { %1777 = vmatmul.bf16.vlgmr.msra.gmra.mxu1 %v4574_v31  ;;  %v2854_v50 = vld [vmem:[#allocation6 + $0xa8] sm:$0xf0]  ;;  %v3756_v44 = vld [vmem:[#allocation6 + $0x790] sm:$0xf] }
  0x96   :  { %1802 = vmatpush.bf16.msra.mxu3 %v3557_v57  ;;  %1821 = vmatpush.bf16.msrb.mxu1 %v3273_v59  ;;  %v4139_v51 = vld [vmem:[#allocation6 + $0x28c] sm:$0xf]  ;;  %v2857_v58 = vor.u32 %v4075_v49, %v2854_v50  ;;  %v4304_v45 = vld [vmem:[#allocation6 + $0x7ac] sm:$0xf0] }
  0x97   :  { %1790 = vmatmul.bf16.vlgmr.msra.gmra.mxu2 %v4567_v15  ;;  %v3110_v53 = vld [vmem:[#allocation6 + $0x2a8] sm:$0xf0]  ;;  %v2956_v49 = vld [vmem:[#allocation6 + $0x150] sm:$0xf] }
  0x98   :  { %1834 = vmatpush.bf16.msrb.mxu2 %v3529_v60  ;;  %1809 = vmatpush.bf16.msrb.mxu0 %v2985_v6  ;;  %v4203_v54 = vld [vmem:[#allocation6 + $0x48c] sm:$0xf]  ;;  %v3113_v59 = vor.u32 %v4139_v51, %v3110_v53  ;;  %v4104_v50 = vld [vmem:[#allocation6 + $0x16c] sm:$0xf0] }
  0x99   :  { %1803 = vmatmul.bf16.vlgmr.msra.gmra.mxu3 %v4569_v16  ;;  %v3366_v55 = vld [vmem:[#allocation6 + $0x4a8] sm:$0xf0]  ;;  %v3212_v51 = vld [vmem:[#allocation6 + $0x350] sm:$0xf] }
  0x9a   :  { %1847 = vmatpush.bf16.msrb.mxu3 %v3785_v0  ;;  %1822 = vmatpush.bf16.msrb.mxu1 %v3241_v7  ;;  %v4267_v56 = vld [vmem:[#allocation6 + $0x68c] sm:$0xf]  ;;  %v3369_v60 = vor.u32 %v4203_v54, %v3366_v55  ;;  %v4168_v53 = vld [vmem:[#allocation6 + $0x36c] sm:$0xf0] }
  0x9b   :  { %v3622_v57 = vld [vmem:[#allocation6 + $0x6a8] sm:$0xf0]  ;;  %v3468_v54 = vld [vmem:[#allocation6 + $0x550] sm:$0xf] }
  0x9c   :  { %1835 = vmatpush.bf16.msrb.mxu2 %v3497_v8  ;;  %1810 = vmatpush.bf16.msrb.mxu0 %v2953_v20  ;;  %v4067_v61 = vld [vmem:[#allocation6 + $0x4c] sm:$0xf]  ;;  %v3625_v0 = vor.u32 %v4267_v56, %v3622_v57  ;;  %v3020_v20 = vld [vmem:[#allocation6 + $0x1d0] sm:$0xf] }
  0x9d   :  { %v2822_v62 = vld [vmem:[#allocation6 + $0x68] sm:$0xf0]  ;;  %v4232_v55 = vld [vmem:[#allocation6 + $0x56c] sm:$0xf0] }
  0x9e   :  { %1848 = vmatpush.bf16.msrb.mxu3 %v3753_v12  ;;  %1823 = vmatpush.bf16.msrb.mxu1 %v3209_v21  ;;  %v4131_v63 = vld [vmem:[#allocation6 + $0x24c] sm:$0xf]  ;;  %v2825_v6 = vor.u32 %v4067_v61, %v2822_v62  ;;  %v4120_v21 = vld [vmem:[#allocation6 + $0x1ec] sm:$0xf0] }
  0x9f   :  { %v3078_v1 = vld [vmem:[#allocation6 + $0x268] sm:$0xf0]  ;;  %v3724_v56 = vld [vmem:[#allocation6 + $0x750] sm:$0xf] }
  0xa0   :  { %1836 = vmatpush.bf16.msrb.mxu2 %v3465_v22  ;;  %1811 = vmatpush.bf16.msrb.mxu0 %v2921_v34  ;;  %v4195_v2 = vld [vmem:[#allocation6 + $0x44c] sm:$0xf]  ;;  %v3081_v9 = vor.u32 %v4131_v63, %v3078_v1  ;;  %v3276_v22 = vld [vmem:[#allocation6 + $0x3d0] sm:$0xf]  ;;  %v3021_v34 = vor.u32 %v4120_v21, %v3020_v20 }
  0xa1   :  { %v3334_v3 = vld [vmem:[#allocation6 + $0x468] sm:$0xf0]  ;;  %v4296_v57 = vld [vmem:[#allocation6 + $0x76c] sm:$0xf0] }
  0xa2   :  { %1849 = vmatpush.bf16.msrb.mxu3 %v3721_v26  ;;  %1824 = vmatpush.bf16.msrb.mxu1 %v3177_v35  ;;  %v4259_v4 = vld [vmem:[#allocation6 + $0x64c] sm:$0xf]  ;;  %v3337_v10 = vor.u32 %v4195_v2, %v3334_v3  ;;  %v4248_v26 = vld [vmem:[#allocation6 + $0x5ec] sm:$0xf0]  ;;  %v3277_v35 = vor.u32 %v4184_v24, %v3276_v22 }
  0xa3   :  { %v3590_v5 = vld [vmem:[#allocation6 + $0x668] sm:$0xf0]  ;;  %v2924_v61 = vld [vmem:[#allocation6 + $0x110] sm:$0xf] }
  0xa4   :  { %1837 = vmatpush.bf16.msrb.mxu2 %v3433_v36  ;;  %1812 = vmatpush.bf16.msrb.mxu0 %v2889_v46  ;;  %v4059_v7 = vld [vmem:[#allocation6 + $0xc] sm:$0xf]  ;;  %v3593_v14 = vor.u32 %v4259_v4, %v3590_v5  ;;  %v3533_v36 = vor.u32 %v4248_v26, %v3532_v25  ;;  %v2989_v46 = vor.u32 %v4112_v38, %v2988_v37  ;;  %v4096_v62 = vld [vmem:[#allocation6 + $0x12c] sm:$0xf0] }
  0xa5   :  { %v2790_v8 = vld [vmem:[#allocation6 + $0x28] sm:$0xf0]  ;;  %v3180_v63 = vld [vmem:[#allocation6 + $0x310] sm:$0xf] }
  0xa6   :  { %1850 = vmatpush.bf16.msrb.mxu3 %v3689_v40  ;;  %1825 = vmatpush.bf16.msrb.mxu1 %v3145_v47  ;;  %v4123_v11 = vld [vmem:[#allocation6 + $0x20c] sm:$0xf]  ;;  %v2793_v23 = vor.u32 %v4059_v7, %v2790_v8  ;;  %v3789_v40 = vor.u32 %v4312_v32, %v3788_v29  ;;  %v3245_v47 = vor.u32 %v4176_v41, %v3244_v39  ;;  %v4160_v1 = vld [vmem:[#allocation6 + $0x32c] sm:$0xf0] }
  0xa7   :  { %v3046_v12 = vld [vmem:[#allocation6 + $0x228] sm:$0xf0]  ;;  %v3436_v2 = vld [vmem:[#allocation6 + $0x510] sm:$0xf]  ;;  %v3181_v7 = vor.u32 %v4160_v1, %v3180_v63  ;;  %v4244_v63 = vld [vmem:[#allocation6 + $0x5d4] sm:$0xf] }
  0xa8   :  { %1838 = vmatpush.bf16.msrb.mxu2 %v3401_v48  ;;  %1813 = vmatpush.bf16.msrb.mxu0 %v2857_v58  ;;  %v4187_v13 = vld [vmem:[#allocation6 + $0x40c] sm:$0xf]  ;;  %v3049_v27 = vor.u32 %v4123_v11, %v3046_v12  ;;  %v3501_v48 = vor.u32 %v4240_v43, %v3500_v42  ;;  %v2957_v58 = vor.u32 %v4104_v50, %v2956_v49  ;;  %v4224_v3 = vld [vmem:[#allocation6 + $0x52c] sm:$0xf0] }
  0xa9   :  { %v3302_v17 = vld [vmem:[#allocation6 + $0x428] sm:$0xf0]  ;;  %v3692_v4 = vld [vmem:[#allocation6 + $0x710] sm:$0xf]  ;;  %v3437_v8 = vor.u32 %v4224_v3, %v3436_v2  ;;  %v4308_v3 = vld [vmem:[#allocation6 + $0x7d4] sm:$0xf] }
  0xaa   :  { %1851 = vmatpush.bf16.msrb.mxu3 %v3657_v52  ;;  %1826 = vmatpush.bf16.msrb.mxu1 %v3113_v59  ;;  %v4251_v18 = vld [vmem:[#allocation6 + $0x60c] sm:$0xf]  ;;  %v3305_v28 = vor.u32 %v4187_v13, %v3302_v17  ;;  %v3757_v52 = vor.u32 %v4304_v45, %v3756_v44  ;;  %v3213_v59 = vor.u32 %v4168_v53, %v3212_v51  ;;  %v4288_v5 = vld [vmem:[#allocation6 + $0x72c] sm:$0xf0] }
  0xab   :  { %v3558_v19 = vld [vmem:[#allocation6 + $0x628] sm:$0xf0]  ;;  %v3148_v11 = vld [vmem:[#allocation6 + $0x2d0] sm:$0xf]  ;;  %v3693_v12 = vor.u32 %v4288_v5, %v3692_v4  ;;  %v3790_v4 = vld [vmem:[#allocation6 + $0x7f0] sm:$0xf0] }
  0xac   :  { %1839 = vmatpush.bf16.msrb.mxu2 %v3369_v60  ;;  %1814 = vmatpush.bf16.msrb.mxu0 %v2825_v6  ;;  %v3561_v33 = vor.u32 %v4251_v18, %v3558_v19  ;;  %v3469_v60 = vor.u32 %v4232_v55, %v3468_v54  ;;  %v2925_v6 = vor.u32 %v4096_v62, %v2924_v61  ;;  %v4152_v13 = vld [vmem:[#allocation6 + $0x2ec] sm:$0xf0]  ;;  %v3278_v62 = vld [vmem:[#allocation6 + $0x3f0] sm:$0xf0] }
  0xad   :  { %v4216_v17 = vld [vmem:[#allocation6 + $0x4ec] sm:$0xf0]  ;;  %v3149_v21 = vor.u32 %v4152_v13, %v3148_v11  ;;  %v4172_v11 = vld [vmem:[#allocation6 + $0x394] sm:$0xf] }
  0xae   :  { %1852 = vmatpush.bf16.msrb.mxu3 %v3625_v0  ;;  %1827 = vmatpush.bf16.msrb.mxu1 %v3081_v9  ;;  %v3725_v0 = vor.u32 %v4296_v57, %v3724_v56  ;;  %v2892_v9 = vld [vmem:[#allocation6 + $0xd0] sm:$0xf]  ;;  %v3246_v13 = vld [vmem:[#allocation6 + $0x3b0] sm:$0xf0] }
  0xaf   :  { %v3660_v18 = vld [vmem:[#allocation6 + $0x6d0] sm:$0xf] }
  0xb0   :  { %1840 = vmatpush.bf16.msrb.mxu2 %v3337_v10  ;;  %1815 = vmatpush.bf16.msrb.mxu0 %v2793_v23  ;;  %v4088_v10 = vld [vmem:[#allocation6 + $0xec] sm:$0xf0] }
  0xb1   :  { %v4280_v19 = vld [vmem:[#allocation6 + $0x6ec] sm:$0xf0]  ;;  %v2893_v20 = vor.u32 %v4088_v10, %v2892_v9  ;;  %v4108_v9 = vld [vmem:[#allocation6 + $0x194] sm:$0xf] }
  0xb2   :  { %1853 = vmatpush.bf16.msrb.mxu3 %v3593_v14  ;;  %1828 = vmatpush.bf16.msrb.mxu1 %v3049_v27  ;;  %v3404_v14 = vld [vmem:[#allocation6 + $0x4d0] sm:$0xf]  ;;  %v3661_v26 = vor.u32 %v4280_v19, %v3660_v18  ;;  %v2990_v10 = vld [vmem:[#allocation6 + $0x1b0] sm:$0xf0] }
  0xb3   :  { %1816 = vmatmul.bf16.vlgmr.msrb.gmra.mxu0 %v4572_v30  ;;  %v3405_v22 = vor.u32 %v4216_v17, %v3404_v14  ;;  %v2860_v23 = vld [vmem:[#allocation6 + $0x90] sm:$0xf]  ;;  %v4236_v14 = vld [vmem:[#allocation6 + $0x594] sm:$0xf] }
  0xb4   :  { %1841 = vmatpush.bf16.msrb.mxu2 %v3305_v28  ;;  %1860 = vmatpush.bf16.msra.mxu0 %v3021_v34  ;;  %v4080_v24 = vld [vmem:[#allocation6 + $0xac] sm:$0xf0]  ;;  %v3502_v17 = vld [vmem:[#allocation6 + $0x5b0] sm:$0xf0] }
  0xb5   :  { %1829 = vmatmul.bf16.vlgmr.msrb.gmra.mxu1 %v4574_v31  ;;  %v3116_v25 = vld [vmem:[#allocation6 + $0x290] sm:$0xf]  ;;  %v2861_v34 = vor.u32 %v4080_v24, %v2860_v23  ;;  %v4300_v18 = vld [vmem:[#allocation6 + $0x794] sm:$0xf] }
  0xb6   :  { %1854 = vmatpush.bf16.msrb.mxu3 %v3561_v33  ;;  %1873 = vmatpush.bf16.msra.mxu1 %v3277_v35  ;;  %v4144_v27 = vld [vmem:[#allocation6 + $0x2ac] sm:$0xf0]  ;;  %v3758_v19 = vld [vmem:[#allocation6 + $0x7b0] sm:$0xf0] }
  0xb7   :  { %1842 = vmatmul.bf16.vlgmr.msrb.gmra.mxu2 %v4567_v15  ;;  %v3372_v28 = vld [vmem:[#allocation6 + $0x490] sm:$0xf]  ;;  %v3117_v35 = vor.u32 %v4144_v27, %v3116_v25  ;;  %v4100_v23 = vld [vmem:[#allocation6 + $0x154] sm:$0xf] }
  0xb8   :  { %1886 = vmatpush.bf16.msra.mxu2 %v3533_v36  ;;  %1861 = vmatpush.bf16.msra.mxu0 %v2989_v46  ;;  %v4208_v29 = vld [vmem:[#allocation6 + $0x4ac] sm:$0xf0]  ;;  %v2958_v24 = vld [vmem:[#allocation6 + $0x170] sm:$0xf0] }
  0xb9   :  { %1855 = vmatmul.bf16.vlgmr.msrb.gmra.mxu3 %v4569_v16  ;;  %v3628_v32 = vld [vmem:[#allocation6 + $0x690] sm:$0xf]  ;;  %v3373_v36 = vor.u32 %v4208_v29, %v3372_v28  ;;  %v4164_v25 = vld [vmem:[#allocation6 + $0x354] sm:$0xf] }
  0xba   :  { %1899 = vmatpush.bf16.msra.mxu3 %v3789_v40  ;;  %1874 = vmatpush.bf16.msra.mxu1 %v3245_v47  ;;  %v4272_v33 = vld [vmem:[#allocation6 + $0x6ac] sm:$0xf0]  ;;  %v3214_v27 = vld [vmem:[#allocation6 + $0x370] sm:$0xf0] }
  0xbb   :  { %v2828_v37 = vld [vmem:[#allocation6 + $0x50] sm:$0xf]  ;;  %v3629_v40 = vor.u32 %v4272_v33, %v3628_v32  ;;  %v4228_v28 = vld [vmem:[#allocation6 + $0x554] sm:$0xf] }
  0xbc   :  { %1887 = vmatpush.bf16.msra.mxu2 %v3501_v48  ;;  %1862 = vmatpush.bf16.msra.mxu0 %v2957_v58  ;;  %v4072_v38 = vld [vmem:[#allocation6 + $0x6c] sm:$0xf0]  ;;  %v4116_v58 = vld [vmem:[#allocation6 + $0x1d4] sm:$0xf] }
  0xbd   :  { %v3084_v39 = vld [vmem:[#allocation6 + $0x250] sm:$0xf]  ;;  %v2829_v46 = vor.u32 %v4072_v38, %v2828_v37  ;;  %v3470_v29 = vld [vmem:[#allocation6 + $0x570] sm:$0xf0] }
  0xbe   :  { %1900 = vmatpush.bf16.msra.mxu3 %v3757_v52  ;;  %1875 = vmatpush.bf16.msra.mxu1 %v3213_v59  ;;  %v4136_v41 = vld [vmem:[#allocation6 + $0x26c] sm:$0xf0]  ;;  %v3022_v59 = vld [vmem:[#allocation6 + $0x1f0] sm:$0xf0] }
  0xbf   :  { %v3340_v42 = vld [vmem:[#allocation6 + $0x450] sm:$0xf]  ;;  %v3085_v49 = vor.u32 %v4136_v41, %v3084_v39  ;;  %v4292_v32 = vld [vmem:[#allocation6 + $0x754] sm:$0xf] }
  0xc0   :  { %1888 = vmatpush.bf16.msra.mxu2 %v3469_v60  ;;  %1863 = vmatpush.bf16.msra.mxu0 %v2925_v6  ;;  %v4200_v43 = vld [vmem:[#allocation6 + $0x46c] sm:$0xf0]  ;;  %v4180_v60 = vld [vmem:[#allocation6 + $0x3d4] sm:$0xf]  ;;  %v3025_v6 = vor.u32 %v4116_v58, %v3022_v59 }
  0xc1   :  { %v3596_v44 = vld [vmem:[#allocation6 + $0x650] sm:$0xf]  ;;  %v3341_v50 = vor.u32 %v4200_v43, %v3340_v42  ;;  %v3726_v33 = vld [vmem:[#allocation6 + $0x770] sm:$0xf0] }
  0xc2   :  { %1901 = vmatpush.bf16.msra.mxu3 %v3725_v0  ;;  %1876 = vmatpush.bf16.msra.mxu1 %v3181_v7  ;;  %v4264_v45 = vld [vmem:[#allocation6 + $0x66c] sm:$0xf0]  ;;  %v3534_v0 = vld [vmem:[#allocation6 + $0x5f0] sm:$0xf0]  ;;  %v3281_v7 = vor.u32 %v4180_v60, %v3278_v62 }
  0xc3   :  { %v2796_v47 = vld [vmem:[#allocation6 + $0x10] sm:$0xf]  ;;  %v3597_v54 = vor.u32 %v4264_v45, %v3596_v44  ;;  %v4092_v37 = vld [vmem:[#allocation6 + $0x114] sm:$0xf] }
  0xc4   :  { %1889 = vmatpush.bf16.msra.mxu2 %v3437_v8  ;;  %1864 = vmatpush.bf16.msra.mxu0 %v2893_v20  ;;  %v4064_v48 = vld [vmem:[#allocation6 + $0x2c] sm:$0xf0]  ;;  %v3537_v8 = vor.u32 %v4244_v63, %v3534_v0  ;;  %v2993_v20 = vor.u32 %v4108_v9, %v2990_v10  ;;  %v2926_v38 = vld [vmem:[#allocation6 + $0x130] sm:$0xf0] }
  0xc5   :  { %v3052_v51 = vld [vmem:[#allocation6 + $0x210] sm:$0xf]  ;;  %v2797_v61 = vor.u32 %v4064_v48, %v2796_v47  ;;  %v4156_v39 = vld [vmem:[#allocation6 + $0x314] sm:$0xf] }
  0xc6   :  { %1902 = vmatpush.bf16.msra.mxu3 %v3693_v12  ;;  %1877 = vmatpush.bf16.msra.mxu1 %v3149_v21  ;;  %v4128_v52 = vld [vmem:[#allocation6 + $0x22c] sm:$0xf0]  ;;  %v3793_v12 = vor.u32 %v4308_v3, %v3790_v4  ;;  %v3249_v21 = vor.u32 %v4172_v11, %v3246_v13  ;;  %v3182_v41 = vld [vmem:[#allocation6 + $0x330] sm:$0xf0] }
  0xc7   :  { %v3308_v53 = vld [vmem:[#allocation6 + $0x410] sm:$0xf]  ;;  %v3053_v1 = vor.u32 %v4128_v52, %v3052_v51  ;;  %v4220_v42 = vld [vmem:[#allocation6 + $0x514] sm:$0xf]  ;;  %v3185_v47 = vor.u32 %v4156_v39, %v3182_v41  ;;  %v4121_v41 = vld [vmem:[#allocation6 + $0x1f4] sm:$0xf0] }
  0xc8   :  { %1890 = vmatpush.bf16.msra.mxu2 %v3405_v22  ;;  %1865 = vmatpush.bf16.msra.mxu0 %v2861_v34  ;;  %v4192_v55 = vld [vmem:[#allocation6 + $0x42c] sm:$0xf0]  ;;  %v3505_v22 = vor.u32 %v4236_v14, %v3502_v17  ;;  %v2961_v34 = vor.u32 %v4100_v23, %v2958_v24  ;;  %v3438_v43 = vld [vmem:[#allocation6 + $0x530] sm:$0xf0] }
  0xc9   :  { %v3564_v56 = vld [vmem:[#allocation6 + $0x610] sm:$0xf]  ;;  %v3309_v2 = vor.u32 %v4192_v55, %v3308_v53  ;;  %v4284_v44 = vld [vmem:[#allocation6 + $0x714] sm:$0xf]  ;;  %v3441_v48 = vor.u32 %v4220_v42, %v3438_v43  ;;  %v3284_v42 = vld [vmem:[#allocation6 + $0x3d8] sm:$0xf] }
  0xca   :  { %1903 = vmatpush.bf16.msra.mxu3 %v3661_v26  ;;  %1878 = vmatpush.bf16.msra.mxu1 %v3117_v35  ;;  %v4256_v57 = vld [vmem:[#allocation6 + $0x62c] sm:$0xf0]  ;;  %v3761_v26 = vor.u32 %v4300_v18, %v3758_v19  ;;  %v3217_v35 = vor.u32 %v4164_v25, %v3214_v27  ;;  %v3694_v45 = vld [vmem:[#allocation6 + $0x730] sm:$0xf0] }
  0xcb   :  { %v3565_v5 = vor.u32 %v4256_v57, %v3564_v56  ;;  %v4148_v51 = vld [vmem:[#allocation6 + $0x2d4] sm:$0xf]  ;;  %v3697_v52 = vor.u32 %v4284_v44, %v3694_v45  ;;  %v4185_v44 = vld [vmem:[#allocation6 + $0x3f4] sm:$0xf0] }
  0xcc   :  { %1891 = vmatpush.bf16.msra.mxu2 %v3373_v36  ;;  %1866 = vmatpush.bf16.msra.mxu0 %v2829_v46  ;;  %v3473_v36 = vor.u32 %v4228_v28, %v3470_v29  ;;  %v2929_v46 = vor.u32 %v4092_v37, %v2926_v38  ;;  %v3150_v53 = vld [vmem:[#allocation6 + $0x2f0] sm:$0xf0]  ;;  %v3540_v45 = vld [vmem:[#allocation6 + $0x5d8] sm:$0xf] }
  0xcd   :  { %v3406_v55 = vld [vmem:[#allocation6 + $0x4f0] sm:$0xf0]  ;;  %v3153_v59 = vor.u32 %v4148_v51, %v3150_v53  ;;  %v4313_v51 = vld [vmem:[#allocation6 + $0x7f4] sm:$0xf0] }
  0xce   :  { %1904 = vmatpush.bf16.msra.mxu3 %v3629_v40  ;;  %1879 = vmatpush.bf16.msra.mxu1 %v3085_v49  ;;  %v3729_v40 = vor.u32 %v4292_v32, %v3726_v33  ;;  %v4084_v49 = vld [vmem:[#allocation6 + $0xd4] sm:$0xf] }
  0xcf   :  { %v4276_v56 = vld [vmem:[#allocation6 + $0x6d4] sm:$0xf] }
  0xd0   :  { %1892 = vmatpush.bf16.msra.mxu2 %v3341_v50  ;;  %1867 = vmatpush.bf16.msra.mxu0 %v2797_v61  ;;  %v2894_v50 = vld [vmem:[#allocation6 + $0xf0] sm:$0xf0] }
  0xd1   :  { %v3662_v57 = vld [vmem:[#allocation6 + $0x6f0] sm:$0xf0]  ;;  %v2897_v58 = vor.u32 %v4084_v49, %v2894_v50  ;;  %v3796_v50 = vld [vmem:[#allocation6 + $0x7d8] sm:$0xf] }
  0xd2   :  { %1905 = vmatpush.bf16.msra.mxu3 %v3597_v54  ;;  %1880 = vmatpush.bf16.msra.mxu1 %v3053_v1  ;;  %v4212_v54 = vld [vmem:[#allocation6 + $0x4d4] sm:$0xf]  ;;  %v3665_v0 = vor.u32 %v4276_v56, %v3662_v57  ;;  %v2996_v57 = vld [vmem:[#allocation6 + $0x198] sm:$0xf] }
  0xd3   :  { %1868 = vmatmul.bf16.vlgmr.msra.gmra.mxu0 %v4572_v30  ;;  %v3409_v60 = vor.u32 %v4212_v54, %v3406_v55  ;;  %v4076_v61 = vld [vmem:[#allocation6 + $0x94] sm:$0xf]  ;;  %v3285_v55 = vor.u32 %v4185_v44, %v3284_v42  ;;  %v4153_v42 = vld [vmem:[#allocation6 + $0x2f4] sm:$0xf0] }
  0xd4   :  { %1893 = vmatpush.bf16.msra.mxu2 %v3309_v2  ;;  %1912 = vmatpush.bf16.msrb.mxu0 %v3025_v6  ;;  %v2862_v62 = vld [vmem:[#allocation6 + $0xb0] sm:$0xf0]  ;;  %v4217_v44 = vld [vmem:[#allocation6 + $0x4f4] sm:$0xf0] }
  0xd5   :  { %1881 = vmatmul.bf16.vlgmr.msra.gmra.mxu1 %v4574_v31  ;;  %v4140_v63 = vld [vmem:[#allocation6 + $0x294] sm:$0xf]  ;;  %v2865_v6 = vor.u32 %v4076_v61, %v2862_v62  ;;  %v3797_v61 = vor.u32 %v4313_v51, %v3796_v50  ;;  %v4177_v62 = vld [vmem:[#allocation6 + $0x3b4] sm:$0xf0] }
  0xd6   :  { %1906 = vmatpush.bf16.msra.mxu3 %v3565_v5  ;;  %1925 = vmatpush.bf16.msrb.mxu1 %v3281_v7  ;;  %v3118_v1 = vld [vmem:[#allocation6 + $0x2b0] sm:$0xf0] }
  0xd7   :  { %1894 = vmatmul.bf16.vlgmr.msra.gmra.mxu2 %v4567_v15  ;;  %v4204_v2 = vld [vmem:[#allocation6 + $0x494] sm:$0xf]  ;;  %v3121_v7 = vor.u32 %v4140_v63, %v3118_v1  ;;  %v3508_v63 = vld [vmem:[#allocation6 + $0x598] sm:$0xf] }
  0xd8   :  { %1938 = vmatpush.bf16.msrb.mxu2 %v3537_v8  ;;  %1913 = vmatpush.bf16.msrb.mxu0 %v2993_v20  ;;  %v3374_v3 = vld [vmem:[#allocation6 + $0x4b0] sm:$0xf0]  ;;  %v3764_v1 = vld [vmem:[#allocation6 + $0x798] sm:$0xf] }
  0xd9   :  { %1907 = vmatmul.bf16.vlgmr.msra.gmra.mxu3 %v4569_v16  ;;  %v4268_v4 = vld [vmem:[#allocation6 + $0x694] sm:$0xf]  ;;  %v3377_v8 = vor.u32 %v4204_v2, %v3374_v3  ;;  %v4305_v2 = vld [vmem:[#allocation6 + $0x7b4] sm:$0xf0] }
  0xda   :  { %1951 = vmatpush.bf16.msrb.mxu3 %v3793_v12  ;;  %1926 = vmatpush.bf16.msrb.mxu1 %v3249_v21  ;;  %v3630_v5 = vld [vmem:[#allocation6 + $0x6b0] sm:$0xf0]  ;;  %v1674_v12 = vpop.f32.mrf.mxu1  ;;  %v1661_v21 = vpop.f32.mrf.mxu0 }
  0xdb   :  { %v4068_v9 = vld [vmem:[#allocation6 + $0x54] sm:$0xf]  ;;  %v3633_v13 = vor.u32 %v4268_v4, %v3630_v5  ;;  %v1675_v25 = vadd.f32 %v1674_v12, %v1661_v21  ;;  %v1687_v33 = vpop.f32.mrf.mxu2  ;;  %v4169_v12 = vld [vmem:[#allocation6 + $0x374] sm:$0xf0] }
  0xdc   :  { %1939 = vmatpush.bf16.msrb.mxu2 %v3505_v22  ;;  %1914 = vmatpush.bf16.msrb.mxu0 %v2961_v34  ;;  %v2830_v10 = vld [vmem:[#allocation6 + $0x70] sm:$0xf0]  ;;  %v1700_v39 = vpop.f32.mrf.mxu3 }
  0xdd   :  { %v4132_v11 = vld [vmem:[#allocation6 + $0x254] sm:$0xf]  ;;  %v2833_v22 = vor.u32 %v4068_v9, %v2830_v10  ;;  %v1688_v38 = vadd.f32 %v1687_v33, %v1675_v25  ;;  %v4105_v9 = vld [vmem:[#allocation6 + $0x174] sm:$0xf0] }
  0xde   :  { %1952 = vmatpush.bf16.msrb.mxu3 %v3761_v26  ;;  %1927 = vmatpush.bf16.msrb.mxu1 %v3217_v35  ;;  %v3086_v14 = vld [vmem:[#allocation6 + $0x270] sm:$0xf0]  ;;  %v3220_v10 = vld [vmem:[#allocation6 + $0x358] sm:$0xf] }
  0xdf   :  { %v4196_v17 = vld [vmem:[#allocation6 + $0x454] sm:$0xf]  ;;  %v3089_v26 = vor.u32 %v4132_v11, %v3086_v14  ;;  %v3765_v11 = vor.u32 %v4305_v2, %v3764_v1  ;;  %v4233_v14 = vld [vmem:[#allocation6 + $0x574] sm:$0xf0] }
  0xe0   :  { %1940 = vmatpush.bf16.msrb.mxu2 %v3473_v36  ;;  %1915 = vmatpush.bf16.msrb.mxu0 %v2929_v46  ;;  %v3342_v18 = vld [vmem:[#allocation6 + $0x470] sm:$0xf0]  ;;  %v4249_v46 = vld [vmem:[#allocation6 + $0x5f4] sm:$0xf0] }
  0xe1   :  { %v4260_v19 = vld [vmem:[#allocation6 + $0x654] sm:$0xf]  ;;  %v3345_v27 = vor.u32 %v4196_v17, %v3342_v18  ;;  %v3541_v56 = vor.u32 %v4249_v46, %v3540_v45  ;;  %v3732_v17 = vld [vmem:[#allocation6 + $0x758] sm:$0xf] }
  0xe2   :  { %1953 = vmatpush.bf16.msrb.mxu3 %v3729_v40  ;;  %1928 = vmatpush.bf16.msrb.mxu1 %v3185_v47  ;;  %v3598_v20 = vld [vmem:[#allocation6 + $0x670] sm:$0xf0]  ;;  %v3028_v40 = vld [vmem:[#allocation6 + $0x1d8] sm:$0xf]  ;;  %v4595_v47 = vadd.f32 %v1700_v39, %v1688_v38 }
  0xe3   :  { %v4060_v23 = vld [vmem:[#allocation6 + $0x14] sm:$0xf]  ;;  %v3601_v34 = vor.u32 %v4260_v19, %v3598_v20  ;;  %v3029_v54 = vor.u32 %v4121_v41, %v3028_v40  ;;  %v1689_v3 = vpop.f32.mrf.mxu2  ;;  %v4297_v18 = vld [vmem:[#allocation6 + $0x774] sm:$0xf0]  ;;  %v3221_v20 = vor.u32 %v4169_v12, %v3220_v10 }
  0xe4   :  { %1941 = vmatpush.bf16.msrb.mxu2 %v3441_v48  ;;  %1916 = vmatpush.bf16.msrb.mxu0 %v2897_v58  ;;  %v2798_v24 = vld [vmem:[#allocation6 + $0x30] sm:$0xf0]  ;;  %v4113_v58 = vld [vmem:[#allocation6 + $0x1b4] sm:$0xf0]  ;;  %v1702_v5 = vpop.f32.mrf.mxu3  ;;  %v3733_v25 = vor.u32 %v4297_v18, %v3732_v17 }
  0xe5   :  { %v4124_v28 = vld [vmem:[#allocation6 + $0x214] sm:$0xf]  ;;  %v2801_v43 = vor.u32 %v4060_v23, %v2798_v24  ;;  %v2997_v4 = vor.u32 %v4113_v58, %v2996_v57  ;;  %v4097_v23 = vld [vmem:[#allocation6 + $0x134] sm:$0xf0] }
  0xe6   :  { %1954 = vmatpush.bf16.msrb.mxu3 %v3697_v52  ;;  %1929 = vmatpush.bf16.msrb.mxu1 %v3153_v59  ;;  %v3054_v29 = vld [vmem:[#allocation6 + $0x230] sm:$0xf0]  ;;  %v1676_v52 = vpop.f32.mrf.mxu1  ;;  %v3252_v59 = vld [vmem:[#allocation6 + $0x398] sm:$0xf] }
  0xe7   :  { %v4188_v32 = vld [vmem:[#allocation6 + $0x414] sm:$0xf]  ;;  %v3057_v48 = vor.u32 %v4124_v28, %v3054_v29  ;;  %v3188_v24 = vld [vmem:[#allocation6 + $0x318] sm:$0xf] }
  0xe8   :  { %1942 = vmatpush.bf16.msrb.mxu2 %v3409_v60  ;;  %1917 = vmatpush.bf16.msrb.mxu0 %v2865_v6  ;;  %v3310_v35 = vld [vmem:[#allocation6 + $0x430] sm:$0xf0]  ;;  %v1663_v60 = vpop.f32.mrf.mxu0  ;;  %v3253_v6 = vor.u32 %v4177_v62, %v3252_v59  ;;  %v4225_v28 = vld [vmem:[#allocation6 + $0x534] sm:$0xf0] }
  0xe9   :  { %v4252_v36 = vld [vmem:[#allocation6 + $0x614] sm:$0xf]  ;;  %v3313_v49 = vor.u32 %v4188_v32, %v3310_v35  ;;  %v3700_v29 = vld [vmem:[#allocation6 + $0x718] sm:$0xf] }
  0xea   :  { %1955 = vmatpush.bf16.msrb.mxu3 %v3665_v0  ;;  %1930 = vmatpush.bf16.msrb.mxu1 %v3121_v7  ;;  %v3566_v37 = vld [vmem:[#allocation6 + $0x630] sm:$0xf0]  ;;  %v4241_v0 = vld [vmem:[#allocation6 + $0x5b4] sm:$0xf0] }
  0xeb   :  { %v3569_v53 = vor.u32 %v4252_v36, %v3566_v37  ;;  %v3509_v7 = vor.u32 %v4241_v0, %v3508_v63  ;;  %v4289_v32 = vld [vmem:[#allocation6 + $0x734] sm:$0xf0] }
  0xec   :  { %1943 = vmatpush.bf16.msrb.mxu2 %v3377_v8  ;;  %1918 = vmatpush.bf16.msrb.mxu0 %v2833_v22  ;;  %v2964_v8 = vld [vmem:[#allocation6 + $0x158] sm:$0xf]  ;;  %v3701_v41 = vor.u32 %v4289_v32, %v3700_v29 }
  0xed   :  { %v2965_v19 = vor.u32 %v4105_v9, %v2964_v8  ;;  %v2932_v22 = vld [vmem:[#allocation6 + $0x118] sm:$0xf] }
  0xee   :  { %1956 = vmatpush.bf16.msrb.mxu3 %v3633_v13  ;;  %1931 = vmatpush.bf16.msrb.mxu1 %v3089_v26  ;;  %v3476_v13 = vld [vmem:[#allocation6 + $0x558] sm:$0xf]  ;;  %v2933_v33 = vor.u32 %v4097_v23, %v2932_v22 }
  0xef   :  { %v3477_v21 = vor.u32 %v4233_v14, %v3476_v13  ;;  %v4161_v26 = vld [vmem:[#allocation6 + $0x334] sm:$0xf0] }
  0xf0   :  { %1944 = vmatpush.bf16.msrb.mxu2 %v3345_v27  ;;  %1919 = vmatpush.bf16.msrb.mxu0 %v2801_v43  ;;  %v3444_v27 = vld [vmem:[#allocation6 + $0x518] sm:$0xf]  ;;  %v3189_v35 = vor.u32 %v4161_v26, %v3188_v24 }
  0xf1   :  { %v3445_v36 = vor.u32 %v4225_v28, %v3444_v27  ;;  %v2900_v37 = vld [vmem:[#allocation6 + $0xd8] sm:$0xf] }
  0xf2   :  { %1957 = vmatpush.bf16.msrb.mxu3 %v3601_v34  ;;  %1932 = vmatpush.bf16.msrb.mxu1 %v3057_v48  ;;  %v1713_v34 = vpop.f32.mrf.mxu0  ;;  %v4089_v38 = vld [vmem:[#allocation6 + $0xf4] sm:$0xf0]  ;;  %v1726_v40 = vpop.f32.mrf.mxu1 }
  0xf3   :  { %1920 = vmatmul.bf16.vlgmr.msrb.gmra.mxu0 %v4572_v30  ;;  %v3156_v39 = vld [vmem:[#allocation6 + $0x2d8] sm:$0xf]  ;;  %v1727_v45 = vadd.f32 %v1726_v40, %v1713_v34  ;;  %v3030_v34 = vld [vmem:[#allocation6 + $0x1f8] sm:$0xf0] }
  0xf4   :  { %1945 = vmatpush.bf16.msrb.mxu2 %v3313_v49  ;;  %1964 = vmatpush.bf16.msra.mxu0 %v3029_v54  ;;  %v3412_v43 = vld [vmem:[#allocation6 + $0x4d8] sm:$0xf]  ;;  %v2901_v49 = vor.u32 %v4089_v38, %v2900_v37  ;;  %v3157_v50 = vor.u32 %v4153_v42, %v3156_v39  ;;  %v3286_v37 = vld [vmem:[#allocation6 + $0x3f8] sm:$0xf0] }
  0xf5   :  { %1933 = vmatmul.bf16.vlgmr.msrb.gmra.mxu1 %v4574_v31  ;;  %v3668_v46 = vld [vmem:[#allocation6 + $0x6d8] sm:$0xf]  ;;  %v3413_v51 = vor.u32 %v4217_v44, %v3412_v43  ;;  %v4245_v38 = vld [vmem:[#allocation6 + $0x5dc] sm:$0xf] }
  0xf6   :  { %1958 = vmatpush.bf16.msrb.mxu3 %v3569_v53  ;;  %1977 = vmatpush.bf16.msra.mxu1 %v3285_v55  ;;  %v4281_v48 = vld [vmem:[#allocation6 + $0x6f4] sm:$0xf0]  ;;  %v3542_v39 = vld [vmem:[#allocation6 + $0x5f8] sm:$0xf0] }
  0xf7   :  { %1946 = vmatmul.bf16.vlgmr.msrb.gmra.mxu2 %v4567_v15  ;;  %v2868_v52 = vld [vmem:[#allocation6 + $0x98] sm:$0xf]  ;;  %v4309_v42 = vld [vmem:[#allocation6 + $0x7dc] sm:$0xf] }
  0xf8   :  { %1990 = vmatpush.bf16.msra.mxu2 %v3541_v56  ;;  %1965 = vmatpush.bf16.msra.mxu0 %v2997_v4  ;;  %v4081_v53 = vld [vmem:[#allocation6 + $0xb4] sm:$0xf0]  ;;  %v3669_v56 = vor.u32 %v4281_v48, %v3668_v46  ;;  %v3798_v43 = vld [vmem:[#allocation6 + $0x7f8] sm:$0xf0]  ;;  %v3545_v48 = vor.u32 %v4245_v38, %v3542_v39 }
  0xf9   :  { %1959 = vmatmul.bf16.vlgmr.msrb.gmra.mxu3 %v4569_v16  ;;  %v3124_v54 = vld [vmem:[#allocation6 + $0x298] sm:$0xf]  ;;  %v2869_v0 = vor.u32 %v4081_v53, %v2868_v52  ;;  %v3801_v52 = vor.u32 %v4309_v42, %v3798_v43  ;;  %v3254_v53 = vld [vmem:[#allocation6 + $0x3b8] sm:$0xf0] }
  0xfa   :  { %2003 = vmatpush.bf16.msra.mxu3 %v3797_v61  ;;  %1978 = vmatpush.bf16.msra.mxu1 %v3253_v6  ;;  %v1739_v55 = vpop.f32.mrf.mxu2  ;;  %v4145_v57 = vld [vmem:[#allocation6 + $0x2b4] sm:$0xf0]  ;;  %v1715_v2 = vpop.f32.mrf.mxu0  ;;  %v4141_v42 = vld [vmem:[#allocation6 + $0x29c] sm:$0xf] }
  0xfb   :  { %v3380_v58 = vld [vmem:[#allocation6 + $0x498] sm:$0xf]  ;;  %v1740_v60 = vadd.f32 %v1739_v55, %v1727_v45  ;;  %v3125_v3 = vor.u32 %v4145_v57, %v3124_v54  ;;  %v1728_v8 = vpop.f32.mrf.mxu1  ;;  %v4237_v54 = vld [vmem:[#allocation6 + $0x59c] sm:$0xf] }
  0xfc   :  { %1991 = vmatpush.bf16.msra.mxu2 %v3509_v7  ;;  %1966 = vmatpush.bf16.msra.mxu0 %v2965_v19  ;;  %v4209_v59 = vld [vmem:[#allocation6 + $0x4b4] sm:$0xf0]  ;;  %v1752_v61 = vpop.f32.mrf.mxu3  ;;  %v3510_v55 = vld [vmem:[#allocation6 + $0x5b8] sm:$0xf0] }
  0xfd   :  { %v3636_v62 = vld [vmem:[#allocation6 + $0x698] sm:$0xf]  ;;  %v4601_v1 = vadd.f32 %v1752_v61, %v1740_v60  ;;  %v3381_v4 = vor.u32 %v4209_v59, %v3380_v58  ;;  %v3766_v57 = vld [vmem:[#allocation6 + $0x7b8] sm:$0xf0]  ;;  %v3513_v60 = vor.u32 %v4237_v54, %v3510_v55 }
  0xfe   :  { %2004 = vmatpush.bf16.msra.mxu3 %v3765_v11  ;;  %1979 = vmatpush.bf16.msra.mxu1 %v3221_v20  ;;  %v4273_v63 = vld [vmem:[#allocation6 + $0x6b4] sm:$0xf0]  ;;  %v4101_v61 = vld [vmem:[#allocation6 + $0x15c] sm:$0xf] }
  0xff   :  { %v2836_v5 = vld [vmem:[#allocation6 + $0x58] sm:$0xf]  ;;  %v3637_v9 = vor.u32 %v4273_v63, %v3636_v62  ;;  %v2966_v62 = vld [vmem:[#allocation6 + $0x178] sm:$0xf0] }
 0x100   :  { %1992 = vmatpush.bf16.msra.mxu2 %v3477_v21  ;;  %1967 = vmatpush.bf16.msra.mxu0 %v2933_v33  ;;  %v4073_v6 = vld [vmem:[#allocation6 + $0x74] sm:$0xf0]  ;;  %v4117_v33 = vld [vmem:[#allocation6 + $0x1dc] sm:$0xf] }
 0x101   :  { %v3092_v7 = vld [vmem:[#allocation6 + $0x258] sm:$0xf]  ;;  %v2837_v17 = vor.u32 %v4073_v6, %v2836_v5  ;;  %v3033_v45 = vor.u32 %v4117_v33, %v3030_v34  ;;  %v4165_v63 = vld [vmem:[#allocation6 + $0x35c] sm:$0xf] }
 0x102   :  { %2005 = vmatpush.bf16.msra.mxu3 %v3733_v25  ;;  %1980 = vmatpush.bf16.msra.mxu1 %v3189_v35  ;;  %v4137_v10 = vld [vmem:[#allocation6 + $0x274] sm:$0xf0]  ;;  %v1741_v25 = vpop.f32.mrf.mxu2  ;;  %v4181_v35 = vld [vmem:[#allocation6 + $0x3dc] sm:$0xf] }
 0x103   :  { %v3348_v11 = vld [vmem:[#allocation6 + $0x458] sm:$0xf]  ;;  %v3093_v20 = vor.u32 %v4137_v10, %v3092_v7  ;;  %v3289_v46 = vor.u32 %v4181_v35, %v3286_v37  ;;  %v3222_v2 = vld [vmem:[#allocation6 + $0x378] sm:$0xf0]  ;;  %v2969_v7 = vor.u32 %v4101_v61, %v2966_v62 }
 0x104   :  { %1993 = vmatpush.bf16.msra.mxu2 %v3445_v36  ;;  %1968 = vmatpush.bf16.msra.mxu0 %v2901_v49  ;;  %v4201_v12 = vld [vmem:[#allocation6 + $0x474] sm:$0xf0]  ;;  %v1754_v32 = vpop.f32.mrf.mxu3  ;;  %v4109_v49 = vld [vmem:[#allocation6 + $0x19c] sm:$0xf]  ;;  %v3225_v8 = vor.u32 %v4165_v63, %v3222_v2 }
 0x105   :  { %v3604_v13 = vld [vmem:[#allocation6 + $0x658] sm:$0xf]  ;;  %v3349_v21 = vor.u32 %v4201_v12, %v3348_v11  ;;  %v4293_v5 = vld [vmem:[#allocation6 + $0x75c] sm:$0xf] }
 0x106   :  { %2006 = vmatpush.bf16.msra.mxu3 %v3701_v41  ;;  %1981 = vmatpush.bf16.msra.mxu1 %v3157_v50  ;;  %v4265_v14 = vld [vmem:[#allocation6 + $0x674] sm:$0xf0]  ;;  %v2998_v50 = vld [vmem:[#allocation6 + $0x1b8] sm:$0xf0] }
 0x107   :  { %v2804_v18 = vld [vmem:[#allocation6 + $0x18] sm:$0xf]  ;;  %v3605_v26 = vor.u32 %v4265_v14, %v3604_v13  ;;  %v3001_v58 = vor.u32 %v4109_v49, %v2998_v50  ;;  %v3734_v6 = vld [vmem:[#allocation6 + $0x778] sm:$0xf0] }
 0x108   :  { %1994 = vmatpush.bf16.msra.mxu2 %v3413_v51  ;;  %1969 = vmatpush.bf16.msra.mxu0 %v2869_v0  ;;  %v4065_v19 = vld [vmem:[#allocation6 + $0x34] sm:$0xf0]  ;;  %v4173_v51 = vld [vmem:[#allocation6 + $0x39c] sm:$0xf]  ;;  %v3737_v13 = vor.u32 %v4293_v5, %v3734_v6 }
 0x109   :  { %v3060_v22 = vld [vmem:[#allocation6 + $0x218] sm:$0xf]  ;;  %v2805_v36 = vor.u32 %v4065_v19, %v2804_v18  ;;  %v3257_v59 = vor.u32 %v4173_v51, %v3254_v53  ;;  %v4093_v10 = vld [vmem:[#allocation6 + $0x11c] sm:$0xf] }
 0x10a   :  { %2007 = vmatpush.bf16.msra.mxu3 %v3669_v56  ;;  %1982 = vmatpush.bf16.msra.mxu1 %v3125_v3  ;;  %v4129_v23 = vld [vmem:[#allocation6 + $0x234] sm:$0xf0]  ;;  %v4301_v56 = vld [vmem:[#allocation6 + $0x79c] sm:$0xf] }
 0x10b   :  { %v3316_v24 = vld [vmem:[#allocation6 + $0x418] sm:$0xf]  ;;  %v3061_v40 = vor.u32 %v4129_v23, %v3060_v22  ;;  %v3769_v0 = vor.u32 %v4301_v56, %v3766_v57  ;;  %v4229_v3 = vld [vmem:[#allocation6 + $0x55c] sm:$0xf] }
 0x10c   :  { %1995 = vmatpush.bf16.msra.mxu2 %v3381_v4  ;;  %v4193_v27 = vld [vmem:[#allocation6 + $0x434] sm:$0xf0]  ;;  %1970 = vmatpush.bf16.msra.mxu0 %v2837_v17  ;;  %v3478_v4 = vld [vmem:[#allocation6 + $0x578] sm:$0xf0] }
 0x10d   :  { %v3572_v28 = vld [vmem:[#allocation6 + $0x618] sm:$0xf]  ;;  %v3317_v41 = vor.u32 %v4193_v27, %v3316_v24  ;;  %v2934_v11 = vld [vmem:[#allocation6 + $0x138] sm:$0xf0] }
 0x10e   :  { %2008 = vmatpush.bf16.msra.mxu3 %v3637_v9  ;;  %v4257_v29 = vld [vmem:[#allocation6 + $0x634] sm:$0xf0]  ;;  %1983 = vmatpush.bf16.msra.mxu1 %v3093_v20  ;;  %v3481_v9 = vor.u32 %v4229_v3, %v3478_v4  ;;  %v4157_v12 = vld [vmem:[#allocation6 + $0x31c] sm:$0xf] }
 0x10f   :  { %v3573_v44 = vor.u32 %v4257_v29, %v3572_v28  ;;  %v3190_v14 = vld [vmem:[#allocation6 + $0x338] sm:$0xf0] }
 0x110   :  { %1996 = vmatpush.bf16.msra.mxu2 %v3349_v21  ;;  %1971 = vmatpush.bf16.msra.mxu0 %v2805_v36  ;;  %v4221_v17 = vld [vmem:[#allocation6 + $0x51c] sm:$0xf]  ;;  %v2937_v21 = vor.u32 %v4093_v10, %v2934_v11  ;;  %v4607_v22 = vpop.f32.mrf.mxu0  ;;  %v3193_v23 = vor.u32 %v4157_v12, %v3190_v14 }
 0x111   :  { %v3446_v18 = vld [vmem:[#allocation6 + $0x538] sm:$0xf0] }
 0x112   :  { %2009 = vmatpush.bf16.msra.mxu3 %v3605_v26  ;;  %1984 = vmatpush.bf16.msra.mxu1 %v3061_v40  ;;  %v4285_v19 = vld [vmem:[#allocation6 + $0x71c] sm:$0xf]  ;;  %v3449_v24 = vor.u32 %v4221_v17, %v3446_v18  ;;  %v4609_v28 = vpop.f32.mrf.mxu1 }
 0x113   :  { %1972 = vmatmul.bf16.vlgmr.msra.gmra.mxu0 %v4572_v30  ;;  %v3702_v20 = vld [vmem:[#allocation6 + $0x738] sm:$0xf0] }
 0x114   :  { %1997 = vmatpush.bf16.msra.mxu2 %v3317_v41  ;;  %2016 = vmatpush.bf16.msrb.mxu0 %v3033_v45  ;;  %v4085_v25 = vld [vmem:[#allocation6 + $0xdc] sm:$0xf]  ;;  %v3705_v29 = vor.u32 %v4285_v19, %v3702_v20 }
 0x115   :  { %1985 = vmatmul.bf16.vlgmr.msra.gmra.mxu1 %v4574_v31  ;;  %v2902_v26 = vld [vmem:[#allocation6 + $0xf8] sm:$0xf0] }
 0x116   :  { %2010 = vmatpush.bf16.msra.mxu3 %v3573_v44  ;;  %2029 = vmatpush.bf16.msrb.mxu1 %v3289_v46  ;;  %v4149_v27 = vld [vmem:[#allocation6 + $0x2dc] sm:$0xf]  ;;  %v2905_v37 = vor.u32 %v4085_v25, %v2902_v26  ;;  %v4329_v25 = vld [vmem:[#allocation9 + $0x78] sm:$0xff] }
 0x117   :  { %1998 = vmatmul.bf16.vlgmr.msra.gmra.mxu2 %v4567_v15  ;;  %v3158_v32 = vld [vmem:[#allocation6 + $0x2f8] sm:$0xf0]  ;;  %v4337_v26 = vld [vmem:[#allocation9 + $0xb8] sm:$0xff] }
 0x118   :  { %2042 = vmatpush.bf16.msrb.mxu2 %v3545_v48  ;;  %2017 = vmatpush.bf16.msrb.mxu0 %v3001_v58  ;;  %v4213_v33 = vld [vmem:[#allocation6 + $0x4dc] sm:$0xf]  ;;  %v3161_v38 = vor.u32 %v4149_v27, %v3158_v32  ;;  %v1767_v53 = vpop.f32.mrf.mxu0  ;;  %v4345_v27 = vld [vmem:[#allocation9 + $0xf8] sm:$0xff] }
 0x119   :  { %2011 = vmatmul.bf16.vlgmr.msra.gmra.mxu3 %v4569_v16  ;;  %v3414_v34 = vld [vmem:[#allocation6 + $0x4f8] sm:$0xf0] }
 0x11a   :  { %2055 = vmatpush.bf16.msrb.mxu3 %v3801_v52  ;;  %2030 = vmatpush.bf16.msrb.mxu1 %v3257_v59  ;;  %v4277_v35 = vld [vmem:[#allocation6 + $0x6dc] sm:$0xf]  ;;  %v3417_v39 = vor.u32 %v4213_v33, %v3414_v34  ;;  %v4611_v43 = vpop.f32.mrf.mxu2  ;;  %v1780_v59 = vpop.f32.mrf.mxu1 }
 0x11b   :  { %v3670_v36 = vld [vmem:[#allocation6 + $0x6f8] sm:$0xf0] }
 0x11c   :  { %2043 = vmatpush.bf16.msrb.mxu2 %v3513_v60  ;;  %2018 = vmatpush.bf16.msrb.mxu0 %v2969_v7  ;;  %v4077_v40 = vld [vmem:[#allocation6 + $0x9c] sm:$0xf]  ;;  %v3673_v44 = vor.u32 %v4277_v35, %v3670_v36  ;;  %v4613_v49 = vpop.f32.mrf.mxu3  ;;  %v4319_v35 = vld [vmem:[#allocation9 + $0x28] sm:$0xff] }
 0x11d   :  { %v2870_v41 = vld [vmem:[#allocation6 + $0xb8] sm:$0xf0]  ;;  %v4327_v36 = vld [vmem:[#allocation9 + $0x68] sm:$0xff] }
 0x11e   :  { %2056 = vmatpush.bf16.msrb.mxu3 %v3769_v0  ;;  %2031 = vmatpush.bf16.msrb.mxu1 %v3225_v8  ;;  %v3126_v45 = vld [vmem:[#allocation6 + $0x2b8] sm:$0xf0]  ;;  %v2873_v52 = vor.u32 %v4077_v40, %v2870_v41 }
 0x11f   :  { %v4205_v46 = vld [vmem:[#allocation6 + $0x49c] sm:$0xf]  ;;  %v3129_v54 = vor.u32 %v4141_v42, %v3126_v45  ;;  %v4342_v42 = vld [vmem:[#allocation9 + $0xe0] sm:$0xff]  ;;  %v4325_v45 = vld [vmem:[#allocation9 + $0x58] sm:$0xff] }
 0x120   :  { %2044 = vmatpush.bf16.msrb.mxu2 %v3481_v9  ;;  %2019 = vmatpush.bf16.msrb.mxu0 %v2937_v21  ;;  %v3382_v48 = vld [vmem:[#allocation6 + $0x4b8] sm:$0xf0] }
 0x121   :  { %v4269_v50 = vld [vmem:[#allocation6 + $0x69c] sm:$0xf]  ;;  %v3385_v55 = vor.u32 %v4205_v46, %v3382_v48  ;;  %v4333_v46 = vld [vmem:[#allocation9 + $0x98] sm:$0xff] }
 0x122   :  { %2057 = vmatpush.bf16.msrb.mxu3 %v3737_v13  ;;  %2032 = vmatpush.bf16.msrb.mxu1 %v3193_v23  ;;  %v3638_v51 = vld [vmem:[#allocation6 + $0x6b8] sm:$0xf0]  ;;  %v1793_v9 = vpop.f32.mrf.mxu2 }
 0x123   :  { %v4069_v56 = vld [vmem:[#allocation6 + $0x5c] sm:$0xf]  ;;  %v3641_v60 = vor.u32 %v4269_v50, %v3638_v51  ;;  %v4621_v50 = vld [vmem:[#allocation8] sm:$0xff]  ;;  %v4339_v9 = vld [vmem:[#allocation9 + $0xc8] sm:$0xff] }
 0x124   :  { %2045 = vmatpush.bf16.msrb.mxu2 %v3449_v24  ;;  %2020 = vmatpush.bf16.msrb.mxu0 %v2905_v37  ;;  %v2838_v57 = vld [vmem:[#allocation6 + $0x78] sm:$0xf0]  ;;  %v1806_v14 = vpop.f32.mrf.mxu3  ;;  %v4321_v24 = vld [vmem:[#allocation9 + $0x38] sm:$0xff]  ;;  %v4335_v37 = vld [vmem:[#allocation9 + $0xa8] sm:$0xff]  ;;  %v2098_v59 = vperm.slane %v4621_v50, 1 }
 0x125   :  { %v4133_v58 = vld [vmem:[#allocation6 + $0x25c] sm:$0xf]  ;;  %v2841_v3 = vor.u32 %v4069_v56, %v2838_v57  ;;  %v4353_v14 = vld [vmem:[#allocation9 + $0x138] sm:$0xff] }
 0x126   :  { %2058 = vmatpush.bf16.msrb.mxu3 %v3705_v29  ;;  %2033 = vmatpush.bf16.msrb.mxu1 %v3161_v38  ;;  %v3094_v61 = vld [vmem:[#allocation6 + $0x278] sm:$0xf0]  ;;  %v4343_v38 = vld [vmem:[#allocation9 + $0xe8] sm:$0xff] }
 0x127   :  { %v4197_v62 = vld [vmem:[#allocation6 + $0x45c] sm:$0xf]  ;;  %v3097_v4 = vor.u32 %v4133_v58, %v3094_v61  ;;  %v2099_v61 = vperm.slane %v4621_v50, 2 }
 0x128   :  { %2046 = vmatpush.bf16.msrb.mxu2 %v3417_v39  ;;  %v3350_v63 = vld [vmem:[#allocation6 + $0x478] sm:$0xf0]  ;;  %2021 = vmatpush.bf16.msrb.mxu0 %v2873_v52  ;;  %v4318_v39 = vld [vmem:[#allocation9 + $0x20] sm:$0xff] }
 0x129   :  { %v4261_v0 = vld [vmem:[#allocation6 + $0x65c] sm:$0xf]  ;;  %v3353_v5 = vor.u32 %v4197_v62, %v3350_v63  ;;  %v2100_v62 = vperm.slane %v4621_v50, 3 }
 0x12a   :  { %2059 = vmatpush.bf16.msrb.mxu3 %v3673_v44  ;;  %v3606_v2 = vld [vmem:[#allocation6 + $0x678] sm:$0xf0]  ;;  %2034 = vmatpush.bf16.msrb.mxu1 %v3129_v54  ;;  %v4317_v44 = vld [vmem:[#allocation9 + $0x18] sm:$0xff] }
 0x12b   :  { %v4061_v6 = vld [vmem:[#allocation6 + $0x1c] sm:$0xf]  ;;  %v3609_v10 = vor.u32 %v4261_v0, %v3606_v2  ;;  %v4341_v54 = vld [vmem:[#allocation9 + $0xd8] sm:$0xff]  ;;  %v4315_v0 = vld [vmem:[#allocation9 + $0x8] sm:$0xff] }
 0x12c   :  { %2047 = vmatpush.bf16.msrb.mxu2 %v3385_v55  ;;  %v2806_v7 = vld [vmem:[#allocation6 + $0x38] sm:$0xf0]  ;;  %2022 = vmatpush.bf16.msrb.mxu0 %v2841_v3  ;;  %v2097_v55 = vperm.slane %v4621_v50, 0  ;;  %v4323_v3 = vld [vmem:[#allocation9 + $0x48] sm:$0xff] }
 0x12d   :  { %v4125_v8 = vld [vmem:[#allocation6 + $0x21c] sm:$0xf]  ;;  %v2809_v19 = vor.u32 %v4061_v6, %v2806_v7  ;;  %v2114_v6 = vadd.f32 %v2098_v59, %v4601_v1  ;;  %v4338_v1 = vld [vmem:[#allocation9 + $0xc0] sm:$0xff]  ;;  %v4365_v59 = vld [vmem:[#allocation9 + $0x198] sm:$0xff] }
 0x12e   :  { %2060 = vmatpush.bf16.msrb.mxu3 %v3641_v60  ;;  %v3062_v11 = vld [vmem:[#allocation6 + $0x238] sm:$0xf0]  ;;  %2035 = vmatpush.bf16.msrb.mxu1 %v3097_v4  ;;  %v2113_v2 = vadd.f32 %v2097_v55, %v4595_v47  ;;  %v4331_v4 = vld [vmem:[#allocation9 + $0x88] sm:$0xff]  ;;  %v4354_v55 = vld [vmem:[#allocation9 + $0x140] sm:$0xff] }
 0x12f   :  { %v4189_v12 = vld [vmem:[#allocation6 + $0x41c] sm:$0xf]  ;;  %v3065_v20 = vor.u32 %v4125_v8, %v3062_v11  ;;  %v2122_v47 = vmax.f32 %v2114_v6, 0.0  ;;  %v4363_v6 = vld [vmem:[#allocation9 + $0x188] sm:$0xff] }
 0x130   :  { %v3318_v13 = vld [vmem:[#allocation6 + $0x438] sm:$0xf0]  ;;  %2048 = vmatpush.bf16.msrb.mxu2 %v3353_v5  ;;  %2023 = vmatpush.bf16.msrb.mxu0 %v2809_v19  ;;  %v1817_v40 = vpop.f32.mrf.mxu0  ;;  %v2121_v11 = vmax.f32 %v2113_v2, 0.0 }
 0x131   :  { %v4253_v17 = vld [vmem:[#allocation6 + $0x61c] sm:$0xf]  ;;  %v3321_v21 = vor.u32 %v4189_v12, %v3318_v13  ;;  %v4322_v12 = vld [vmem:[#allocation9 + $0x40] sm:$0xff] }
 0x132   :  { %v3574_v18 = vld [vmem:[#allocation6 + $0x638] sm:$0xf0]  ;;  %2061 = vmatpush.bf16.msrb.mxu3 %v3609_v10  ;;  %2036 = vmatpush.bf16.msrb.mxu1 %v3065_v20  ;;  %v4314_v10 = vld [vmem:[#allocation9] sm:$0xff]  ;;  %v2129_v20 = vpack.c.bf16 %v2121_v11, %v2121_v11 }
 0x133   :  { %v3577_v23 = vor.u32 %v4253_v17, %v3574_v18  ;;  %v4320_v29 = vld [vmem:[#allocation9 + $0x30] sm:$0xff]  ;;  %2024 = vmatmul.bf16.vlgmr.msrb.gmra.mxu0 %v4572_v30  ;;  %v4326_v30 = vld [vmem:[#allocation9 + $0x60] sm:$0xff]  ;;  %v4361_v17 = vld [vmem:[#allocation9 + $0x178] sm:$0xff] }
 0x134   :  { %2049 = vmatpush.bf16.msrb.mxu2 %v3321_v21  ;;  %2653 = vmatpush.bf16.msra.mxu0 %v4321_v24  ;;  %v4328_v32 = vld [vmem:[#allocation9 + $0x70] sm:$0xff]  ;;  %v4330_v13 = vld [vmem:[#allocation9 + $0x80] sm:$0xff]  ;;  %v2130_v21 = vpack.c.bf16 %v2122_v47, %v2122_v47 }
 0x135   :  { %v4336_v33 = vld [vmem:[#allocation9 + $0xb0] sm:$0xff]  ;;  %2037 = vmatmul.bf16.vlgmr.msrb.gmra.mxu1 %v4574_v31  ;;  %v4334_v31 = vld [vmem:[#allocation9 + $0xa0] sm:$0xff] }
 0x136   :  { %2062 = vmatpush.bf16.msrb.mxu3 %v3577_v23  ;;  %2666 = vmatpush.bf16.msra.mxu1 %v4329_v25  ;;  %v4344_v34 = vld [vmem:[#allocation9 + $0xf0] sm:$0xff] }
 0x137   :  { %2050 = vmatmul.bf16.vlgmr.msrb.gmra.mxu2 %v4567_v15  ;;  %v1830_v15 = vpop.f32.mrf.mxu1  ;;  %v4324_v56 = vld [vmem:[#allocation9 + $0x50] sm:$0xff] }
 0x138   :  { %2679 = vmatpush.bf16.msra.mxu2 %v4337_v26  ;;  %2654 = vmatpush.bf16.msra.mxu0 %v4320_v29  ;;  %v1831_v41 = vadd.f32 %v1830_v15, %v1817_v40  ;;  %v4332_v57 = vld [vmem:[#allocation9 + $0x90] sm:$0xff]  ;;  %v4359_v29 = vld [vmem:[#allocation9 + $0x168] sm:$0xff] }
 0x139   :  { %2063 = vmatmul.bf16.vlgmr.msrb.gmra.mxu3 %v4569_v16  ;;  %v1779_v16 = vadd.f32 %v4609_v28, %v4607_v22  ;;  %v4316_v22 = vld [vmem:[#allocation9 + $0x10] sm:$0xff]  ;;  %v1819_v28 = vpop.f32.mrf.mxu0 }
 0x13a   :  { %2692 = vmatpush.bf16.msra.mxu3 %v4345_v27  ;;  %2667 = vmatpush.bf16.msra.mxu1 %v4328_v32  ;;  %v1843_v48 = vpop.f32.mrf.mxu2  ;;  %v4340_v63 = vld [vmem:[#allocation9 + $0xd0] sm:$0xff]  ;;  %v4351_v27 = vld [vmem:[#allocation9 + $0x128] sm:$0xff]  ;;  %v4350_v32 = vld [vmem:[#allocation9 + $0x120] sm:$0xff] }
 0x13b   :  { %v1792_v52 = vadd.f32 %v4611_v43, %v1779_v16  ;;  %v1844_v53 = vadd.f32 %v1843_v48, %v1831_v41  ;;  %v4352_v23 = vld [vmem:[#allocation9 + $0x130] sm:$0xff]  ;;  %v4355_v48 = vld [vmem:[#allocation9 + $0x148] sm:$0xff]  ;;  %v4346_v28 = vld [vmem:[#allocation9 + $0x100] sm:$0xff] }
 0x13c   :  { %2680 = vmatpush.bf16.msra.mxu2 %v4336_v33  ;;  %2655 = vmatpush.bf16.msra.mxu0 %v4319_v35  ;;  %v1856_v51 = vpop.f32.mrf.mxu3  ;;  %v4360_v24 = vld [vmem:[#allocation9 + $0x170] sm:$0xff] }
 0x13d   :  { %v1805_v60 = vadd.f32 %v4613_v49, %v1792_v52  ;;  %v1857_v43 = vadd.f32 %v1856_v51, %v1844_v53  ;;  %v4348_v15 = vld [vmem:[#allocation9 + $0x110] sm:$0xff]  ;;  %v4369_v51 = vld [vmem:[#allocation9 + $0x1b8] sm:$0xff] }
 0x13e   :  { %2693 = vmatpush.bf16.msra.mxu3 %v4344_v34  ;;  %2668 = vmatpush.bf16.msra.mxu1 %v4327_v36  ;;  %v4358_v34 = vld [vmem:[#allocation9 + $0x160] sm:$0xff]  ;;  %v4376_v47 = vld [vmem:[#allocation9 + $0x1f0] sm:$0xff] }
 0x13f   :  { %v1832_v58 = vpop.f32.mrf.mxu1  ;;  %v2115_v49 = vadd.f32 %v2099_v61, %v1805_v60  ;;  %v2116_v8 = vadd.f32 %v2100_v62, %v1857_v43  ;;  %v4364_v62 = vld [vmem:[#allocation9 + $0x190] sm:$0xff] }
 0x140   :  { %2681 = vmatpush.bf16.msra.mxu2 %v4335_v37  ;;  %2656 = vmatpush.bf16.msra.mxu0 %v4318_v39  ;;  %v4349_v37 = vld [vmem:[#allocation9 + $0x118] sm:$0xff]  ;;  %v4366_v58 = vld [vmem:[#allocation9 + $0x1a0] sm:$0xff] }
 0x141   :  { %v2123_v18 = vmax.f32 %v2115_v49, 0.0  ;;  %v2124_v19 = vmax.f32 %v2116_v8, 0.0 }
 0x142   :  { %2694 = vmatpush.bf16.msra.mxu3 %v4343_v38  ;;  %2669 = vmatpush.bf16.msra.mxu1 %v4326_v30  ;;  %v1845_v5 = vpop.f32.mrf.mxu2  ;;  %v4357_v38 = vld [vmem:[#allocation9 + $0x158] sm:$0xff] }
 0x143   :  { %v2131_v25 = vpack.c.bf16 %v2123_v18, %v2123_v18  ;;  %v2132_v26 = vpack.c.bf16 %v2124_v19, %v2124_v19  ;;  %v4373_v18 = vld [vmem:[#allocation9 + $0x1d8] sm:$0xff] }
 0x144   :  { %2682 = vmatpush.bf16.msra.mxu2 %v4334_v31  ;;  %2657 = vmatpush.bf16.msra.mxu0 %v4317_v44  ;;  %v1858_v7 = vpop.f32.mrf.mxu3  ;;  %v2101_v31 = vperm.slane %v4621_v50, 4 }
 0x146   :  { %2695 = vmatpush.bf16.msra.mxu3 %v4342_v42  ;;  %2670 = vmatpush.bf16.msra.mxu1 %v4325_v45  ;;  %v4356_v42 = vld [vmem:[#allocation9 + $0x150] sm:$0xff] }
 0x148   :  { %2683 = vmatpush.bf16.msra.mxu2 %v4333_v46  ;;  %2658 = vmatpush.bf16.msra.mxu0 %v4316_v22  ;;  %v4347_v46 = vld [vmem:[#allocation9 + $0x108] sm:$0xff] }
 0x14a   :  { %2696 = vmatpush.bf16.msra.mxu3 %v4341_v54  ;;  %2671 = vmatpush.bf16.msra.mxu1 %v4324_v56  ;;  %v4368_v54 = vld [vmem:[#allocation9 + $0x1b0] sm:$0xff]  ;;  %v4367_v56 = vld [vmem:[#allocation9 + $0x1a8] sm:$0xff] }
 0x14c   :  { %2684 = vmatpush.bf16.msra.mxu2 %v4332_v57  ;;  %2659 = vmatpush.bf16.msra.mxu0 %v4315_v0 }
 0x14e   :  { %2697 = vmatpush.bf16.msra.mxu3 %v4340_v63  ;;  %2672 = vmatpush.bf16.msra.mxu1 %v4323_v3  ;;  %v2102_v3 = vperm.slane %v4621_v50, 5 }
 0x150   :  { %2685 = vmatpush.bf16.msra.mxu2 %v4331_v4  ;;  %2660 = vmatpush.bf16.msra.mxu0 %v4314_v10  ;;  %v1869_v33 = vpop.f32.mrf.mxu0  ;;  %v4377_v10 = vld [vmem:[#allocation9 + $0x1f8] sm:$0xff] }
 0x152   :  { %2698 = vmatpush.bf16.msra.mxu3 %v4339_v9  ;;  %2673 = vmatpush.bf16.msra.mxu1 %v4322_v12  ;;  %v1882_v35 = vpop.f32.mrf.mxu1  ;;  %v4362_v9 = vld [vmem:[#allocation9 + $0x180] sm:$0xff] }
 0x153   :  { %2661 = vmatmul.bf16.vlgmr.msra.gmra.mxu0 %v2129_v20  ;;  %v1883_v36 = vadd.f32 %v1882_v35, %v1869_v33  ;;  %v4370_v35 = vld [vmem:[#allocation9 + $0x1c0] sm:$0xff] }
 0x154   :  { %2686 = vmatpush.bf16.msra.mxu2 %v4330_v13  ;;  %2705 = vmatpush.bf16.msrb.mxu0 %v4353_v14  ;;  %v4375_v14 = vld [vmem:[#allocation9 + $0x1e8] sm:$0xff] }
 0x155   :  { %2674 = vmatmul.bf16.vlgmr.msra.gmra.mxu1 %v2130_v21  ;;  %v4372_v21 = vld [vmem:[#allocation9 + $0x1d0] sm:$0xff] }
 0x156   :  { %2718 = vmatpush.bf16.msrb.mxu1 %v4361_v17  ;;  %2699 = vmatpush.bf16.msra.mxu3 %v4338_v1  ;;  %v4374_v17 = vld [vmem:[#allocation9 + $0x1e0] sm:$0xff] }
 0x157   :  { %2687 = vmatmul.bf16.vlgmr.msra.gmra.mxu2 %v2131_v25 }
 0x158   :  { %2706 = vmatpush.bf16.msrb.mxu0 %v4352_v23  ;;  %v1871_v41 = vpop.f32.mrf.mxu0  ;;  %2731 = vmatpush.bf16.msrb.mxu2 %v4369_v51 }
 0x159   :  { %2700 = vmatmul.bf16.vlgmr.msra.gmra.mxu3 %v2132_v26  ;;  %v2103_v26 = vperm.slane %v4621_v50, 6 }
 0x15a   :  { %2719 = vmatpush.bf16.msrb.mxu1 %v4360_v24  ;;  %v1895_v39 = vpop.f32.mrf.mxu2  ;;  %v1884_v44 = vpop.f32.mrf.mxu1  ;;  %2744 = vmatpush.bf16.msrb.mxu3 %v4377_v10 }
 0x15b   :  { %v1896_v40 = vadd.f32 %v1895_v39, %v1883_v36 }
 0x15c   :  { %2707 = vmatpush.bf16.msrb.mxu0 %v4351_v27  ;;  %v1908_v30 = vpop.f32.mrf.mxu3  ;;  %2732 = vmatpush.bf16.msrb.mxu2 %v4368_v54  ;;  %v4371_v27 = vld [vmem:[#allocation9 + $0x1c8] sm:$0xff] }
 0x15d   :  { %v1909_v16 = vadd.f32 %v1908_v30, %v1896_v40 }
 0x15e   :  { %2720 = vmatpush.bf16.msrb.mxu1 %v4359_v29  ;;  %2745 = vmatpush.bf16.msrb.mxu3 %v4376_v47 }
 0x15f   :  { %v2117_v45 = vadd.f32 %v2101_v31, %v1909_v16 }
 0x160   :  { %2708 = vmatpush.bf16.msrb.mxu0 %v4350_v32  ;;  %2733 = vmatpush.bf16.msrb.mxu2 %v4367_v56 }
 0x161   :  { %v2125_v22 = vmax.f32 %v2117_v45, 0.0 }
 0x162   :  { %2721 = vmatpush.bf16.msrb.mxu1 %v4358_v34  ;;  %v1897_v52 = vpop.f32.mrf.mxu2  ;;  %2746 = vmatpush.bf16.msrb.mxu3 %v4375_v14 }
 0x163   :  { %v2133_v57 = vpack.c.bf16 %v2125_v22, %v2125_v22  ;;  %v4387_v22 = vld [vmem:[%s4645_s4] ss:$0 sm:$0xff]  ;;  %s4524_s4 = smov [#allocation11]  }
 0x164   :  { %2709 = vmatpush.bf16.msrb.mxu0 %v4349_v37  ;;  %v1910_v53 = vpop.f32.mrf.mxu3  ;;  %2734 = vmatpush.bf16.msrb.mxu2 %v4366_v58  ;;  %s2764_s15 = sshll.u32 %s4524_s4, 4  ;;  %s2765_s15 = int_to_ptr.vmem [resolvable:$true] %s2764_s15 }
 0x166   :  { %2722 = vmatpush.bf16.msrb.mxu1 %v4357_v38  ;;  %2747 = vmatpush.bf16.msrb.mxu3 %v4374_v17 }
 0x168   :  { %2710 = vmatpush.bf16.msrb.mxu0 %v4348_v15  ;;  %2735 = vmatpush.bf16.msrb.mxu2 %v4365_v59 }
 0x16a   :  { %2723 = vmatpush.bf16.msrb.mxu1 %v4356_v42  ;;  %2748 = vmatpush.bf16.msrb.mxu3 %v4373_v18  ;;  %v2104_v42 = vperm.slane %v4621_v50, 7 }
 0x16c   :  { %2711 = vmatpush.bf16.msrb.mxu0 %v4347_v46  ;;  %2736 = vmatpush.bf16.msrb.mxu2 %v4364_v62 }
 0x16e   :  { %2724 = vmatpush.bf16.msrb.mxu1 %v4355_v48  ;;  %2749 = vmatpush.bf16.msrb.mxu3 %v4372_v21 }
 0x170   :  { %2712 = vmatpush.bf16.msrb.mxu0 %v4346_v28  ;;  %v1921_v60 = vpop.f32.mrf.mxu0  ;;  %2737 = vmatpush.bf16.msrb.mxu2 %v4363_v6 }
 0x172   :  { %2725 = vmatpush.bf16.msrb.mxu1 %v4354_v55  ;;  %v1934_v61 = vpop.f32.mrf.mxu1  ;;  %2750 = vmatpush.bf16.msrb.mxu3 %v4371_v27 }
 0x173   :  { %2713 = vmatmul.bf16.vlgmr.msrb.gmra.mxu0 %v2133_v57  ;;  %v1935_v43 = vadd.f32 %v1934_v61, %v1921_v60 }
 0x174   :  { %2738 = vmatpush.bf16.msrb.mxu2 %v4362_v9 }
 0x176   :  { %2751 = vmatpush.bf16.msrb.mxu3 %v4370_v35 }
 0x178   :  { %v1923_v5 = vpop.f32.mrf.mxu0 }
 0x17a   :  { %v1947_v63 = vpop.f32.mrf.mxu2  ;;  %v1936_v7 = vpop.f32.mrf.mxu1 }
 0x17b   :  { %v1948_v0 = vadd.f32 %v1947_v63, %v1935_v43 }
 0x17c   :  { %v1960_v2 = vpop.f32.mrf.mxu3 }
 0x17d   :  { %v1961_v4 = vadd.f32 %v1960_v2, %v1948_v0 }
 0x17f   :  { %v2118_v49 = vadd.f32 %v2102_v3, %v1961_v4 }
 0x181   :  { %v2126_v8 = vmax.f32 %v2118_v49, 0.0 }
 0x182   :  { %v1949_v11 = vpop.f32.mrf.mxu2 }
 0x183   :  { %v2134_v12 = vpack.c.bf16 %v2126_v8, %v2126_v8 }
 0x184   :  { %v1962_v13 = vpop.f32.mrf.mxu3 }
 0x185   :  { %2726 = vmatmul.bf16.vlgmr.msrb.gmra.mxu1 %v2134_v12 }
 0x190   :  { %v1973_v19 = vpop.f32.mrf.mxu0 }
 0x192   :  { %v1986_v1 = vpop.f32.mrf.mxu1 }
 0x193   :  { %v1987_v20 = vadd.f32 %v1986_v1, %v1973_v19 }
 0x198   :  { %v1975_v32 = vpop.f32.mrf.mxu0 }
 0x19a   :  { %v1999_v23 = vpop.f32.mrf.mxu2  ;;  %v1988_v33 = vpop.f32.mrf.mxu1 }
 0x19b   :  { %v2000_v24 = vadd.f32 %v1999_v23, %v1987_v20 }
 0x19c   :  { %v2012_v25 = vpop.f32.mrf.mxu3 }
 0x19d   :  { %v2013_v29 = vadd.f32 %v2012_v25, %v2000_v24 }
 0x19f   :  { %v2119_v34 = vadd.f32 %v2103_v26, %v2013_v29 }
 0x1a1   :  { %v2127_v36 = vmax.f32 %v2119_v34, 0.0 }
 0x1a2   :  { %v2001_v37 = vpop.f32.mrf.mxu2 }
 0x1a3   :  { %v2135_v38 = vpack.c.bf16 %v2127_v36, %v2127_v36 }
 0x1a4   :  { %v2014_v39 = vpop.f32.mrf.mxu3 }
 0x1a5   :  { %2739 = vmatmul.bf16.vlgmr.msrb.gmra.mxu2 %v2135_v38 }
 0x1b0   :  { %v2025_v40 = vpop.f32.mrf.mxu0 }
 0x1b2   :  { %v2038_v30 = vpop.f32.mrf.mxu1 }
 0x1b3   :  { %v2039_v31 = vadd.f32 %v2038_v30, %v2025_v40 }
 0x1b8   :  { %v2027_v44 = vpop.f32.mrf.mxu0 }
 0x1ba   :  { %v2051_v15 = vpop.f32.mrf.mxu2  ;;  %v2040_v45 = vpop.f32.mrf.mxu1 }
 0x1bb   :  { %v2052_v41 = vadd.f32 %v2051_v15, %v2039_v31 }
 0x1bc   :  { %v2064_v16 = vpop.f32.mrf.mxu3 }
 0x1bd   :  { %v2065_v46 = vadd.f32 %v2064_v16, %v2052_v41 }
 0x1bf   :  { %v2120_v48 = vadd.f32 %v2104_v42, %v2065_v46 }
 0x1c1   :  { %v2128_v51 = vmax.f32 %v2120_v48, 0.0 }
 0x1c2   :  { %v2053_v52 = vpop.f32.mrf.mxu2 }
 0x1c3   :  { %v2136_v54 = vpack.c.bf16 %v2128_v51, %v2128_v51 }
 0x1c4   :  { %v2066_v53 = vpop.f32.mrf.mxu3 }
 0x1c5   :  { %2752 = vmatmul.bf16.vlgmr.msrb.gmra.mxu3 %v2136_v54 }
 0x1d0   :  { %v2662_v28 = vpop.f32.mrf.mxu0 }
 0x1d1   :  { %v2663_v55 = vadd.f32 %v4387_v22, %v2662_v28 }
 0x1d2   :  { %v2675_v56 = vpop.f32.mrf.mxu1 }
 0x1d3   :  { %v2676_v57 = vadd.f32 %v2675_v56, %v2663_v55 }
 0x1d8   :  { %v2664_v59 = vpop.f32.mrf.mxu0 }
 0x1da   :  { %v2688_v58 = vpop.f32.mrf.mxu2  ;;  %v2677_v60 = vpop.f32.mrf.mxu1 }
 0x1db   :  { %v2689_v50 = vadd.f32 %v2688_v58, %v2676_v57 }
 0x1dc   :  { %v2701_v61 = vpop.f32.mrf.mxu3 }
 0x1dd   :  { %v2702_v43 = vadd.f32 %v2701_v61, %v2689_v50 }
 0x1e2   :  { %v2690_v62 = vpop.f32.mrf.mxu2 }
 0x1e4   :  { %v2703_v63 = vpop.f32.mrf.mxu3 }
 0x1f0   :  { %v2714_v0 = vpop.f32.mrf.mxu0 }
 0x1f1   :  { %v2715_v2 = vadd.f32 %v2714_v0, %v2702_v43 }
 0x1f8   :  { %v2716_v3 = vpop.f32.mrf.mxu0 }
 0x202   :  { %v2727_v4 = vpop.f32.mrf.mxu1 }
 0x203   :  { %v2728_v49 = vadd.f32 %v2727_v4, %v2715_v2 }
 0x20a   :  { %v2729_v5 = vpop.f32.mrf.mxu1 }
 0x228   :  { %v2740_v6 = vpop.f32.mrf.mxu2 }
 0x229   :  { %v2741_v8 = vadd.f32 %v2740_v6, %v2728_v49 }
 0x230   :  { %v2742_v7 = vpop.f32.mrf.mxu2 }
 0x248   :  { %v2753_v9 = vpop.f32.mrf.mxu3 }
 0x249   :  { %v2754_v10 = vadd.f32 %v2753_v9, %v2741_v8 }
 0x24b   :  { %v2757_v11 = vmax.f32 %v2754_v10, 0.0 }
 0x24d   :  { %2758 = vst [vmem:[#allocation11] sm:$0xff] %v2757_v11 }
 0x24e   :  { %2769 = dma.vmem_to_hbm [thread:$0]  %s2765_s15, 128, %s2767_s18, [#allocation5]  }
 0x250   :  { %v2755_v12 = vpop.f32.mrf.mxu3 }
 0x251   :  { %4514 = dma.done.wait [#allocation5], 128  }
 0x252   :  { %4515 = vsyncadd [#allocation5], 4294967168 }
 0x253   :  { %2774 = vsyncpa [#allocation4], 1 }
 0x254   :  { %2775 = vsyncpa [#allocation7], 1 }
 0x255   :  { %2776 = vsyncpa [#allocation10], 1 }
 0x256   :  { %2777 = vsyncpa [#allocation5], 1 }

</bundles_post_ra>
